<compile_context>
chip_gen: v6e
topology: v6e:2x2x1
jax: 0.10.0
libtpu: 0.0.40
codegen_flags: <defaults>
</compile_context>

<pallas_src>
import jax
import jax.numpy as jnp
from jax.experimental import pallas as pl
from jax.experimental.pallas import tpu as pltpu

# ---- model config (matches the PyTorch module at small scale) ----
Q_DIM = 4
Z_DIM = 6
OUT_DIM = 4
HIDDEN = 32
NUM_HEADS = 4
HEAD_DIM = HIDDEN // NUM_HEADS
NUM_LAYERS = 2
FF_DIM = HIDDEN * 4
SEQ = 3            # tokens: [z, q, p]
EPS = 1e-5
BATCH = 2

D_IN = Z_DIM + 2 * Q_DIM      # 14 = packed raw-feature width [z | q | p]
OUT_PAD = 128                 # lane-dense padded output width

# per-layer weight slab row offsets (all blocks transposed, start at lane 0)
R_WIN = 0                     # w_inT (H, 3H)
R_W1 = HIDDEN                 # w1T   (H, FF_DIM)
R_WO = 2 * HIDDEN             # w_oT  (H, H)
R_W2 = 3 * HIDDEN             # w2T   (FF_DIM, H)
WL_ROWS = 3 * HIDDEN + FF_DIM  # 224


def wg_layout(B):
    """Row offsets of the global weight/constant slab (all offsets 8-aligned)."""
    BS = B * SEQ
    BSN = BS * NUM_HEADS
    r8 = lambda n: (n + 7) // 8 * 8
    blocks = (("emb", D_IN), ("wq", HIDDEN), ("wp", HIDDEN),
              ("rep", BSN), ("hm", BSN), ("grp", BSN),
              ("neg", BS), ("bias", BS), ("gq", B), ("gp", B), ("bout", 1))
    off, r = {}, 0
    for name, rows in blocks:
        off[name] = r
        r += r8(rows)
    return off, r


# --------------------------- Pallas kernel ---------------------------------
def transformer_kernel(inp_ref, wL_ref, vL_ref, wG_ref, out_ref):
    H, NH, S = HIDDEN, NUM_HEADS, SEQ
    BS = inp_ref.shape[0]
    B = BS // S
    BSN = BS * NH
    off, _ = wg_layout(B)

    def mm(x, w):                                   # (M,K) @ (K,N) on the MXU
        return jax.lax.dot_general(x, w, (((1,), (0,)), ((), ())),
                                   preferred_element_type=jnp.float32)

    def mm_nt(x, w):                                # q @ k^T (contract both last dims)
        return jax.lax.dot_general(x, w, (((1,), (1,)), ((), ())),
                                   preferred_element_type=jnp.float32)

    def layer_norm(x, w, b):
        mu = jnp.mean(x, axis=-1, keepdims=True)
        d = x - mu
        var = jnp.mean(d * d, axis=-1, keepdims=True)
        return d * jax.lax.rsqrt(var + EPS) * w + b

    # ---- packed global constants (loaded once) ----
    w_embT = wG_ref[off['emb']:off['emb'] + D_IN, 0:H]       # (D_IN, H)
    rep_mat = wG_ref[off['rep']:off['rep'] + BSN, 0:BS]      # (BSN, BS)
    head_msk = wG_ref[off['hm']:off['hm'] + BSN, 0:H]        # (BSN, H)
    grp = wG_ref[off['grp']:off['grp'] + BSN, 0:BSN]         # (BSN, BSN) same-head groups
    neg_msk = wG_ref[off['neg']:off['neg'] + BS, 0:BSN]      # (BS, BSN) 0 / -1e30
    bias_pos = wG_ref[off['bias']:off['bias'] + BS, 0:H]     # (BS, H)

    # ---- fused token embeddings + positional bias (one 2-D matmul) ----
    x2 = mm(inp_ref[...], w_embT) + bias_pos                 # (BS, H)

    for i in range(NUM_LAYERS):                    # static unroll over layers
        # -- multi-head self-attention: all heads & batches in 2-D matmuls --
        # (softmax 1/sqrt(head_dim) folded into the Q columns of w_inT)
        qkv = mm(x2, wL_ref[i, R_WIN:R_WIN + H, 0:3 * H]) + vL_ref[i, 0:1, 0:3 * H]
        q2 = qkv[:, 0:H]
        k2 = qkv[:, H:2 * H]
        v2 = qkv[:, 2 * H:3 * H]

        # expand K/V: one row per (batch, key token, head), lanes outside the
        # head zeroed -- constant replicate matmul + 2-D mask (no reshapes).
        ke = mm(rep_mat, k2) * head_msk                      # (BSN, H)
        ve = mm(rep_mat, v2) * head_msk                      # (BSN, H)

        s = mm_nt(q2, ke) + neg_msk                          # (BS, BSN); cross-batch -> -1e30
        # Row max is over all heads of the query's batch (it cancels
        # algebraically); the 1e-30 guard below keeps a fully-underflowed head
        # from producing inf/NaN.
        s = s - jnp.max(s, axis=-1, keepdims=True)
        e = jnp.exp(s)                                       # cross-batch entries underflow to 0
        denom = mm(e, grp) + 1e-30                           # per-(batch, head) key sums
        r = pl.reciprocal(denom, approx=True)                # EUP slot
        r = r * (2.0 - denom * r)                            # one Newton step ~= exact f32
        ctx = mm(e * r, ve)                                  # (BS, H); heads land in own lanes

        attn = mm(ctx, wL_ref[i, R_WO:R_WO + H, 0:H]) + vL_ref[i, 2:3, 0:H]
        x2 = layer_norm(x2 + attn, vL_ref[i, 4:5, 0:H], vL_ref[i, 5:6, 0:H])

        # -- feed-forward (ReLU), post-norm --
        h1 = jnp.maximum(
            mm(x2, wL_ref[i, R_W1:R_W1 + H, 0:FF_DIM]) + vL_ref[i, 1:2, 0:FF_DIM], 0.0)
        ff = mm(h1, wL_ref[i, R_W2:R_W2 + FF_DIM, 0:H]) + vL_ref[i, 3:4, 0:H]
        x2 = layer_norm(x2 + ff, vL_ref[i, 6:7, 0:H], vL_ref[i, 7:8, 0:H])

    # ---- output: one-hot row gathers + lane-disjoint projections, one lane-dense store ----
    x_q = mm(wG_ref[off['gq']:off['gq'] + B, 0:BS], x2)      # (B, H)  q-token rows
    x_p = mm(wG_ref[off['gp']:off['gp'] + B, 0:BS], x2)      # (B, H)  p-token rows
    out_ref[...] = (mm(x_q, wG_ref[off['wq']:off['wq'] + H, :])
                    + mm(x_p, wG_ref[off['wp']:off['wp'] + H, :])
                    + wG_ref[off['bout']:off['bout'] + 1, :])


# --------------------------- host-side packing -------------------------------
def pack_params(P, B=BATCH):
    """One-time host-side packing of torch-layout params into 3 kernel slabs."""
    H, L = HIDDEN, NUM_LAYERS
    scale = 1.0 / (HEAD_DIM ** 0.5)
    inw = P['inw'].at[:, :H, :].multiply(scale)     # fold softmax scale into Q rows
    inb = P['inb'].at[:, :H].multiply(scale)

    # per-layer weights, each block stored TRANSPOSED (in-dim rows, out-dim lanes)
    wL = jnp.zeros((L, WL_ROWS, 128), jnp.float32)
    wL = wL.at[:, R_WIN:R_WIN + H, 0:3 * H].set(jnp.swapaxes(inw, 1, 2))
    wL = wL.at[:, R_W1:R_W1 + H, 0:FF_DIM].set(jnp.swapaxes(P['l1w'], 1, 2))
    wL = wL.at[:, R_WO:R_WO + H, 0:H].set(jnp.swapaxes(P['ow'], 1, 2))
    wL = wL.at[:, R_W2:R_W2 + FF_DIM, 0:H].set(jnp.swapaxes(P['l2w'], 1, 2))

    vL = jnp.zeros((L, 8, 128), jnp.float32)
    vL = vL.at[:, 0, 0:3 * H].set(inb)
    vL = vL.at[:, 1, 0:FF_DIM].set(P['l1b'])
    vL = vL.at[:, 2, 0:H].set(P['ob'])
    vL = vL.at[:, 3, 0:H].set(P['l2b'])
    vL = vL.at[:, 4, 0:H].set(P['ln1w'])
    vL = vL.at[:, 5, 0:H].set(P['ln1b'])
    vL = vL.at[:, 6, 0:H].set(P['ln2w'])
    vL = vL.at[:, 7, 0:H].set(P['ln2b'])

    off, rows = wg_layout(B)
    BS, NH, HD = B * SEQ, NUM_HEADS, HEAD_DIM
    BSN = BS * NH
    wG = jnp.zeros((rows, 128), jnp.float32)

    # fused embedding weight (transposed; input slab column blocks are [z | q | p])
    e0 = off['emb']
    wG = wG.at[e0:e0 + Z_DIM, 0:H].set(P['ze_w'].T)
    wG = wG.at[e0 + Z_DIM:e0 + Z_DIM + Q_DIM, 0:H].set(P['qe_w'].T)
    wG = wG.at[e0 + Z_DIM + Q_DIM:e0 + D_IN, 0:H].set(P['pe_w'].T)

    # lane-disjoint output projections (q -> lanes 0:4, p -> lanes 4:8)
    wG = wG.at[off['wq']:off['wq'] + H, 0:OUT_DIM].set(P['qo_w'].T)
    wG = wG.at[off['wp']:off['wp'] + H, OUT_DIM:2 * OUT_DIM].set(P['po_w'].T)

    # attention constants: key/value slab row index c = (b*SEQ + j)*NH + h
    c = jnp.arange(BSN)
    key_tok, head = c // NH, c % NH
    key_batch = c // (SEQ * NH)
    rep = (key_tok[:, None] == jnp.arange(BS)[None, :]).astype(jnp.float32)
    hm = (head[:, None] == jnp.arange(H)[None, :] // HD).astype(jnp.float32)
    grp = (head[:, None] == head[None, :]).astype(jnp.float32)
    q_batch = jnp.arange(BS) // SEQ
    neg = jnp.where(q_batch[:, None] == key_batch[None, :], 0.0, -1e30)
    wG = wG.at[off['rep']:off['rep'] + BSN, 0:BS].set(rep)
    wG = wG.at[off['hm']:off['hm'] + BSN, 0:H].set(hm)
    wG = wG.at[off['grp']:off['grp'] + BSN, 0:BSN].set(grp)
    wG = wG.at[off['neg']:off['neg'] + BS, 0:BSN].set(neg)

    # per-(batch, token) embedding bias + positional embedding, pre-tiled to (BS, H)
    bias_pos = jnp.stack([P['ze_b'], P['qe_b'], P['pe_b']], axis=0) + P['pos']
    wG = wG.at[off['bias']:off['bias'] + BS, 0:H].set(jnp.tile(bias_pos, (B, 1)))

    # one-hot row gathers for the q (token 1) / p (token 2) readouts
    rows_bs = jnp.arange(BS)[None, :]
    gq = (rows_bs == (jnp.arange(B) * SEQ + 1)[:, None]).astype(jnp.float32)
    gp = (rows_bs == (jnp.arange(B) * SEQ + 2)[:, None]).astype(jnp.float32)
    wG = wG.at[off['gq']:off['gq'] + B, 0:BS].set(gq)
    wG = wG.at[off['gp']:off['gp'] + B, 0:BS].set(gp)

    # merged output bias (lanes 0:4 q, 4:8 p)
    wG = wG.at[off['bout'], 0:OUT_DIM].set(P['qo_b'])
    wG = wG.at[off['bout'], OUT_DIM:2 * OUT_DIM].set(P['po_b'])
    return wL, vL, wG


# --------------------------- wrapper ----------------------------------------
def simple_transformer_pallas(q, p, z, packed):
    wL, vL, wG = packed
    B = q.shape[0]

    # one zero-padded, token-major input slab: row (b, s) holds that token's raw
    # features in its own column block ([z | q | p]), zeros elsewhere.
    inp = jnp.zeros((B, SEQ, D_IN), jnp.float32)
    inp = inp.at[:, 0, 0:Z_DIM].set(z)
    inp = inp.at[:, 1, Z_DIM:Z_DIM + Q_DIM].set(q)
    inp = inp.at[:, 2, Z_DIM + Q_DIM:D_IN].set(p)
    inp = inp.reshape(B * SEQ, D_IN)

    args = [inp, wL, vL, wG]
    vmem_spec = pl.BlockSpec(memory_space=pltpu.MemorySpace.VMEM)

    out = pl.pallas_call(
        transformer_kernel,
        in_specs=[vmem_spec] * len(args),
        out_specs=vmem_spec,
        out_shape=jax.ShapeDtypeStruct((B, OUT_PAD), jnp.float32),
    )(*args)

    return out[:, 0:OUT_DIM], out[:, OUT_DIM:2 * OUT_DIM]


# --------------------------- pure-JAX reference ------------------------------
def simple_transformer_ref(q, p, z, P):
    lin = lambda x, w, b: x @ w.T + b
    ln = lambda x, w, b: (x - x.mean(-1, keepdims=True)) / jnp.sqrt(
        ((x - x.mean(-1, keepdims=True)) ** 2).mean(-1, keepdims=True) + EPS) * w + b

    q_emb = lin(q, P['qe_w'], P['qe_b'])
    p_emb = lin(p, P['pe_w'], P['pe_b'])
    z_emb = lin(z, P['ze_w'], P['ze_b'])
    x = jnp.concatenate([z_emb[:, None], q_emb[:, None], p_emb[:, None]], 1) + P['pos']
    for i in range(NUM_LAYERS):
        qkv = lin(x, P['inw'][i], P['inb'][i])
        qh, kh, vh = jnp.split(qkv, 3, axis=-1)
        B = x.shape[0]
        rs = lambda t: t.reshape(B, SEQ, NUM_HEADS, HEAD_DIM).transpose(0, 2, 1, 3)
        qh, kh, vh = rs(qh), rs(kh), rs(vh)
        s = jnp.einsum('bhqd,bhkd->bhqk', qh, kh) / (HEAD_DIM ** 0.5)
        a = jax.nn.softmax(s, axis=-1)
        o = jnp.einsum('bhqk,bhkd->bhqd', a, vh).transpose(0, 2, 1, 3).reshape(B, SEQ, HIDDEN)
        x = ln(x + lin(o, P['ow'][i], P['ob'][i]), P['ln1w'][i], P['ln1b'][i])
        ff = lin(jax.nn.relu(lin(x, P['l1w'][i], P['l1b'][i])), P['l2w'][i], P['l2b'][i])
        x = ln(x + ff, P['ln2w'][i], P['ln2b'][i])
    return lin(x[:, 1], P['qo_w'], P['qo_b']), lin(x[:, 2], P['po_w'], P['po_b'])


# --------------------------- main --------------------------------------------
if __name__ == "__main__":
    key = jax.random.PRNGKey(0)
    ks = jax.random.split(key, 24)
    rnd = lambda k, shape, s=0.1: (jax.random.normal(k, shape) * s).astype(jnp.float32)

    P = dict(
        qe_w=rnd(ks[0], (HIDDEN, Q_DIM)), qe_b=rnd(ks[1], (HIDDEN,)),
        pe_w=rnd(ks[2], (HIDDEN, Q_DIM)), pe_b=rnd(ks[3], (HIDDEN,)),
        ze_w=rnd(ks[4], (HIDDEN, Z_DIM)), ze_b=rnd(ks[5], (HIDDEN,)),
        pos=jnp.zeros((SEQ, HIDDEN), jnp.float32),   # matches torch.zeros init
        inw=rnd(ks[6], (NUM_LAYERS, 3 * HIDDEN, HIDDEN)),
        inb=rnd(ks[7], (NUM_LAYERS, 3 * HIDDEN)),
        ow=rnd(ks[8], (NUM_LAYERS, HIDDEN, HIDDEN)),
        ob=rnd(ks[9], (NUM_LAYERS, HIDDEN)),
        l1w=rnd(ks[10], (NUM_LAYERS, FF_DIM, HIDDEN)),
        l1b=rnd(ks[11], (NUM_LAYERS, FF_DIM)),
        l2w=rnd(ks[12], (NUM_LAYERS, HIDDEN, FF_DIM)),
        l2b=rnd(ks[13], (NUM_LAYERS, HIDDEN)),
        ln1w=jnp.ones((NUM_LAYERS, HIDDEN), jnp.float32),
        ln1b=jnp.zeros((NUM_LAYERS, HIDDEN), jnp.float32),
        ln2w=jnp.ones((NUM_LAYERS, HIDDEN), jnp.float32),
        ln2b=jnp.zeros((NUM_LAYERS, HIDDEN), jnp.float32),
        qo_w=rnd(ks[14], (OUT_DIM, HIDDEN)), qo_b=rnd(ks[15], (OUT_DIM,)),
        po_w=rnd(ks[16], (OUT_DIM, HIDDEN)), po_b=rnd(ks[17], (OUT_DIM,)),
    )

    q = rnd(ks[18], (BATCH, Q_DIM), 1.0)
    p = rnd(ks[19], (BATCH, Q_DIM), 1.0)
    z = rnd(ks[20], (BATCH, Z_DIM), 1.0)

    packed = pack_params(P, BATCH)
    q_pred, p_pred = simple_transformer_pallas(q, p, z, packed)
    jax.block_until_ready((q_pred, p_pred))

    q_exp, p_exp = simple_transformer_ref(q, p, z, P)
    assert jnp.allclose(q_pred, q_exp, atol=1e-4, rtol=1e-4)
    assert jnp.allclose(p_pred, p_exp, atol=1e-4, rtol=1e-4)

    print("KERNEL_OK")
</pallas_src>

<mosaic_0001>
module attributes {stable_mosaic.version = 11 : i64} {
  func.func @transformer_kernel(%arg0: memref<6x14xf32, #tpu.memory_space<vmem>>, %arg1: memref<2x224x128xf32, #tpu.memory_space<vmem>>, %arg2: memref<2x8x128xf32, #tpu.memory_space<vmem>>, %arg3: memref<192x128xf32, #tpu.memory_space<vmem>>, %arg4: memref<2x128xf32, #tpu.memory_space<vmem>>) attributes {dimension_semantics = [], scalar_prefetch = 0 : i64, scratch_operands = 0 : i64, tpu.core_type = #tpu.core_type<tc>} {
    %c0 = arith.constant 0 : index
    %c0_0 = arith.constant 0 : index
    %0 = vector.load %arg3[%c0, %c0_0] : memref<192x128xf32, #tpu.memory_space<vmem>>, vector<14x32xf32>
    %c80 = arith.constant 80 : index
    %c0_1 = arith.constant 0 : index
    %1 = vector.load %arg3[%c80, %c0_1] : memref<192x128xf32, #tpu.memory_space<vmem>>, vector<24x6xf32>
    %c104 = arith.constant 104 : index
    %c0_2 = arith.constant 0 : index
    %2 = vector.load %arg3[%c104, %c0_2] : memref<192x128xf32, #tpu.memory_space<vmem>>, vector<24x32xf32>
    %c128 = arith.constant 128 : index
    %c0_3 = arith.constant 0 : index
    %3 = vector.load %arg3[%c128, %c0_3] : memref<192x128xf32, #tpu.memory_space<vmem>>, vector<24x24xf32>
    %c152 = arith.constant 152 : index
    %c0_4 = arith.constant 0 : index
    %4 = vector.load %arg3[%c152, %c0_4] : memref<192x128xf32, #tpu.memory_space<vmem>>, vector<6x24xf32>
    %c160 = arith.constant 160 : index
    %c0_5 = arith.constant 0 : index
    %5 = vector.load %arg3[%c160, %c0_5] : memref<192x128xf32, #tpu.memory_space<vmem>>, vector<6x32xf32>
    %c0_6 = arith.constant 0 : index
    %c0_7 = arith.constant 0 : index
    %6 = vector.load %arg0[%c0_6, %c0_7] : memref<6x14xf32, #tpu.memory_space<vmem>>, vector<6x14xf32>
    %cst = arith.constant dense<0.000000e+00> : vector<6x32xf32>
    %7 = tpu.matmul %6, %0, %cst {dimension_numbers = #tpu.dot_dimension_numbers<[1], [0], [0], [1], [0, 0, 1, 1], [], []>} : vector<6x14xf32>, vector<14x32xf32>, vector<6x32xf32> -> vector<6x32xf32>
    %8 = arith.addf %7, %5 : vector<6x32xf32>
    %c0_8 = arith.constant 0 : index
    %c0_9 = arith.constant 0 : index
    %c0_10 = arith.constant 0 : index
    %9 = vector.load %arg1[%c0_8, %c0_9, %c0_10] : memref<2x224x128xf32, #tpu.memory_space<vmem>>, vector<1x32x96xf32>
    %10 = vector.shape_cast %9 : vector<1x32x96xf32> to vector<32x96xf32>
    %cst_11 = arith.constant dense<0.000000e+00> : vector<6x96xf32>
    %11 = tpu.matmul %8, %10, %cst_11 {dimension_numbers = #tpu.dot_dimension_numbers<[1], [0], [0], [1], [0, 0, 1, 1], [], []>} : vector<6x32xf32>, vector<32x96xf32>, vector<6x96xf32> -> vector<6x96xf32>
    %c0_12 = arith.constant 0 : index
    %c0_13 = arith.constant 0 : index
    %c0_14 = arith.constant 0 : index
    %12 = vector.load %arg2[%c0_12, %c0_13, %c0_14] : memref<2x8x128xf32, #tpu.memory_space<vmem>>, vector<1x1x96xf32>
    %13 = vector.shape_cast %12 : vector<1x1x96xf32> to vector<1x96xf32>
    %14 = vector.broadcast %13 : vector<1x96xf32> to vector<6x96xf32>
    %15 = arith.addf %11, %14 : vector<6x96xf32>
    %16 = vector.extract_strided_slice %15 {offsets = [0, 0], sizes = [6, 32], strides = [1, 1]} : vector<6x96xf32> to vector<6x32xf32>
    %17 = vector.extract_strided_slice %15 {offsets = [0, 32], sizes = [6, 32], strides = [1, 1]} : vector<6x96xf32> to vector<6x32xf32>
    %18 = vector.extract_strided_slice %15 {offsets = [0, 64], sizes = [6, 32], strides = [1, 1]} : vector<6x96xf32> to vector<6x32xf32>
    %cst_15 = arith.constant dense<0.000000e+00> : vector<24x32xf32>
    %19 = tpu.matmul %1, %17, %cst_15 {dimension_numbers = #tpu.dot_dimension_numbers<[1], [0], [0], [1], [0, 0, 1, 1], [], []>} : vector<24x6xf32>, vector<6x32xf32>, vector<24x32xf32> -> vector<24x32xf32>
    %20 = arith.mulf %19, %2 : vector<24x32xf32>
    %cst_16 = arith.constant dense<0.000000e+00> : vector<24x32xf32>
    %21 = tpu.matmul %1, %18, %cst_16 {dimension_numbers = #tpu.dot_dimension_numbers<[1], [0], [0], [1], [0, 0, 1, 1], [], []>} : vector<24x6xf32>, vector<6x32xf32>, vector<24x32xf32> -> vector<24x32xf32>
    %22 = arith.mulf %21, %2 : vector<24x32xf32>
    %cst_17 = arith.constant dense<0.000000e+00> : vector<6x24xf32>
    %23 = tpu.matmul %16, %20, %cst_17 {dimension_numbers = #tpu.dot_dimension_numbers<[1], [1], [0], [0], [0, 0, 1, 0], [], []>} : vector<6x32xf32>, vector<24x32xf32>, vector<6x24xf32> -> vector<6x24xf32>
    %24 = arith.addf %23, %4 : vector<6x24xf32>
    %cst_18 = arith.constant dense<0xFF800000> : vector<6xf32>
    %25 = vector.multi_reduction <maximumf>, %24, %cst_18 [1] : vector<6x24xf32> to vector<6xf32>
    %26 = vector.shape_cast %25 : vector<6xf32> to vector<6x1xf32>
    %27 = vector.broadcast %26 : vector<6x1xf32> to vector<6x24xf32>
    %28 = arith.subf %24, %27 : vector<6x24xf32>
    %29 = math.exp %28 : vector<6x24xf32>
    %cst_19 = arith.constant dense<0.000000e+00> : vector<6x24xf32>
    %30 = tpu.matmul %29, %3, %cst_19 {dimension_numbers = #tpu.dot_dimension_numbers<[1], [0], [0], [1], [0, 0, 1, 1], [], []>} : vector<6x24xf32>, vector<24x24xf32>, vector<6x24xf32> -> vector<6x24xf32>
    %cst_20 = arith.constant 1.000000e-30 : f32
    %31 = vector.broadcast %cst_20 : f32 to vector<6x24xf32>
    %32 = arith.addf %30, %31 : vector<6x24xf32>
    %33 = tpu.reciprocal %32 {approx = true} : vector<6x24xf32> -> vector<6x24xf32>
    %34 = arith.mulf %32, %33 : vector<6x24xf32>
    %cst_21 = arith.constant 2.000000e+00 : f32
    %35 = vector.broadcast %cst_21 : f32 to vector<6x24xf32>
    %36 = arith.subf %35, %34 : vector<6x24xf32>
    %37 = arith.mulf %33, %36 : vector<6x24xf32>
    %38 = arith.mulf %29, %37 : vector<6x24xf32>
    %cst_22 = arith.constant dense<0.000000e+00> : vector<6x32xf32>
    %39 = tpu.matmul %38, %22, %cst_22 {dimension_numbers = #tpu.dot_dimension_numbers<[1], [0], [0], [1], [0, 0, 1, 1], [], []>} : vector<6x24xf32>, vector<24x32xf32>, vector<6x32xf32> -> vector<6x32xf32>
    %c0_23 = arith.constant 0 : index
    %c64 = arith.constant 64 : index
    %c0_24 = arith.constant 0 : index
    %40 = vector.load %arg1[%c0_23, %c64, %c0_24] : memref<2x224x128xf32, #tpu.memory_space<vmem>>, vector<1x32x32xf32>
    %41 = vector.shape_cast %40 : vector<1x32x32xf32> to vector<32x32xf32>
    %cst_25 = arith.constant dense<0.000000e+00> : vector<6x32xf32>
    %42 = tpu.matmul %39, %41, %cst_25 {dimension_numbers = #tpu.dot_dimension_numbers<[1], [0], [0], [1], [0, 0, 1, 1], [], []>} : vector<6x32xf32>, vector<32x32xf32>, vector<6x32xf32> -> vector<6x32xf32>
    %c0_26 = arith.constant 0 : index
    %c2 = arith.constant 2 : index
    %c0_27 = arith.constant 0 : index
    %43 = vector.load %arg2[%c0_26, %c2, %c0_27] : memref<2x8x128xf32, #tpu.memory_space<vmem>>, vector<1x1x32xf32>
    %44 = vector.shape_cast %43 : vector<1x1x32xf32> to vector<1x32xf32>
    %45 = vector.broadcast %44 : vector<1x32xf32> to vector<6x32xf32>
    %46 = arith.addf %42, %45 : vector<6x32xf32>
    %47 = arith.addf %8, %46 : vector<6x32xf32>
    %c0_28 = arith.constant 0 : index
    %c4 = arith.constant 4 : index
    %c0_29 = arith.constant 0 : index
    %48 = vector.load %arg2[%c0_28, %c4, %c0_29] : memref<2x8x128xf32, #tpu.memory_space<vmem>>, vector<1x1x32xf32>
    %49 = vector.shape_cast %48 : vector<1x1x32xf32> to vector<1x32xf32>
    %c0_30 = arith.constant 0 : index
    %c5 = arith.constant 5 : index
    %c0_31 = arith.constant 0 : index
    %50 = vector.load %arg2[%c0_30, %c5, %c0_31] : memref<2x8x128xf32, #tpu.memory_space<vmem>>, vector<1x1x32xf32>
    %51 = vector.shape_cast %50 : vector<1x1x32xf32> to vector<1x32xf32>
    %cst_32 = arith.constant dense<0.000000e+00> : vector<6xf32>
    %52 = vector.multi_reduction <add>, %47, %cst_32 [1] : vector<6x32xf32> to vector<6xf32>
    %53 = vector.shape_cast %52 : vector<6xf32> to vector<6x1xf32>
    %cst_33 = arith.constant 3.200000e+01 : f32
    %54 = vector.broadcast %cst_33 : f32 to vector<6x1xf32>
    %55 = arith.divf %53, %54 : vector<6x1xf32>
    %56 = vector.broadcast %55 : vector<6x1xf32> to vector<6x32xf32>
    %57 = arith.subf %47, %56 : vector<6x32xf32>
    %58 = arith.mulf %57, %57 : vector<6x32xf32>
    %cst_34 = arith.constant dense<0.000000e+00> : vector<6xf32>
    %59 = vector.multi_reduction <add>, %58, %cst_34 [1] : vector<6x32xf32> to vector<6xf32>
    %60 = vector.shape_cast %59 : vector<6xf32> to vector<6x1xf32>
    %cst_35 = arith.constant 3.200000e+01 : f32
    %61 = vector.broadcast %cst_35 : f32 to vector<6x1xf32>
    %62 = arith.divf %60, %61 : vector<6x1xf32>
    %cst_36 = arith.constant 9.99999974E-6 : f32
    %63 = vector.broadcast %cst_36 : f32 to vector<6x1xf32>
    %64 = arith.addf %62, %63 : vector<6x1xf32>
    %65 = math.rsqrt %64 : vector<6x1xf32>
    %66 = vector.broadcast %65 : vector<6x1xf32> to vector<6x32xf32>
    %67 = arith.mulf %57, %66 : vector<6x32xf32>
    %68 = vector.broadcast %49 : vector<1x32xf32> to vector<6x32xf32>
    %69 = arith.mulf %67, %68 : vector<6x32xf32>
    %70 = vector.broadcast %51 : vector<1x32xf32> to vector<6x32xf32>
    %71 = arith.addf %69, %70 : vector<6x32xf32>
    %c0_37 = arith.constant 0 : index
    %c32 = arith.constant 32 : index
    %c0_38 = arith.constant 0 : index
    %72 = vector.load %arg1[%c0_37, %c32, %c0_38] : memref<2x224x128xf32, #tpu.memory_space<vmem>>, vector<1x32x128xf32>
    %73 = vector.shape_cast %72 : vector<1x32x128xf32> to vector<32x128xf32>
    %cst_39 = arith.constant dense<0.000000e+00> : vector<6x128xf32>
    %74 = tpu.matmul %71, %73, %cst_39 {dimension_numbers = #tpu.dot_dimension_numbers<[1], [0], [0], [1], [0, 0, 1, 1], [], []>} : vector<6x32xf32>, vector<32x128xf32>, vector<6x128xf32> -> vector<6x128xf32>
    %c0_40 = arith.constant 0 : index
    %c1 = arith.constant 1 : index
    %c0_41 = arith.constant 0 : index
    %75 = vector.load %arg2[%c0_40, %c1, %c0_41] : memref<2x8x128xf32, #tpu.memory_space<vmem>>, vector<1x1x128xf32>
    %76 = vector.shape_cast %75 : vector<1x1x128xf32> to vector<1x128xf32>
    %77 = vector.broadcast %76 : vector<1x128xf32> to vector<6x128xf32>
    %78 = arith.addf %74, %77 : vector<6x128xf32>
    %cst_42 = arith.constant 0.000000e+00 : f32
    %79 = vector.broadcast %cst_42 : f32 to vector<6x128xf32>
    %80 = arith.maximumf %78, %79 : vector<6x128xf32>
    %c0_43 = arith.constant 0 : index
    %c96 = arith.constant 96 : index
    %c0_44 = arith.constant 0 : index
    %81 = vector.load %arg1[%c0_43, %c96, %c0_44] : memref<2x224x128xf32, #tpu.memory_space<vmem>>, vector<1x128x32xf32>
    %82 = vector.shape_cast %81 : vector<1x128x32xf32> to vector<128x32xf32>
    %cst_45 = arith.constant dense<0.000000e+00> : vector<6x32xf32>
    %83 = tpu.matmul %80, %82, %cst_45 {dimension_numbers = #tpu.dot_dimension_numbers<[1], [0], [0], [1], [0, 0, 1, 1], [], []>} : vector<6x128xf32>, vector<128x32xf32>, vector<6x32xf32> -> vector<6x32xf32>
    %c0_46 = arith.constant 0 : index
    %c3 = arith.constant 3 : index
    %c0_47 = arith.constant 0 : index
    %84 = vector.load %arg2[%c0_46, %c3, %c0_47] : memref<2x8x128xf32, #tpu.memory_space<vmem>>, vector<1x1x32xf32>
    %85 = vector.shape_cast %84 : vector<1x1x32xf32> to vector<1x32xf32>
    %86 = vector.broadcast %85 : vector<1x32xf32> to vector<6x32xf32>
    %87 = arith.addf %83, %86 : vector<6x32xf32>
    %88 = arith.addf %71, %87 : vector<6x32xf32>
    %c0_48 = arith.constant 0 : index
    %c6 = arith.constant 6 : index
    %c0_49 = arith.constant 0 : index
    %89 = vector.load %arg2[%c0_48, %c6, %c0_49] : memref<2x8x128xf32, #tpu.memory_space<vmem>>, vector<1x1x32xf32>
    %90 = vector.shape_cast %89 : vector<1x1x32xf32> to vector<1x32xf32>
    %c0_50 = arith.constant 0 : index
    %c7 = arith.constant 7 : index
    %c0_51 = arith.constant 0 : index
    %91 = vector.load %arg2[%c0_50, %c7, %c0_51] : memref<2x8x128xf32, #tpu.memory_space<vmem>>, vector<1x1x32xf32>
    %92 = vector.shape_cast %91 : vector<1x1x32xf32> to vector<1x32xf32>
    %cst_52 = arith.constant dense<0.000000e+00> : vector<6xf32>
    %93 = vector.multi_reduction <add>, %88, %cst_52 [1] : vector<6x32xf32> to vector<6xf32>
    %94 = vector.shape_cast %93 : vector<6xf32> to vector<6x1xf32>
    %cst_53 = arith.constant 3.200000e+01 : f32
    %95 = vector.broadcast %cst_53 : f32 to vector<6x1xf32>
    %96 = arith.divf %94, %95 : vector<6x1xf32>
    %97 = vector.broadcast %96 : vector<6x1xf32> to vector<6x32xf32>
    %98 = arith.subf %88, %97 : vector<6x32xf32>
    %99 = arith.mulf %98, %98 : vector<6x32xf32>
    %cst_54 = arith.constant dense<0.000000e+00> : vector<6xf32>
    %100 = vector.multi_reduction <add>, %99, %cst_54 [1] : vector<6x32xf32> to vector<6xf32>
    %101 = vector.shape_cast %100 : vector<6xf32> to vector<6x1xf32>
    %cst_55 = arith.constant 3.200000e+01 : f32
    %102 = vector.broadcast %cst_55 : f32 to vector<6x1xf32>
    %103 = arith.divf %101, %102 : vector<6x1xf32>
    %cst_56 = arith.constant 9.99999974E-6 : f32
    %104 = vector.broadcast %cst_56 : f32 to vector<6x1xf32>
    %105 = arith.addf %103, %104 : vector<6x1xf32>
    %106 = math.rsqrt %105 : vector<6x1xf32>
    %107 = vector.broadcast %106 : vector<6x1xf32> to vector<6x32xf32>
    %108 = arith.mulf %98, %107 : vector<6x32xf32>
    %109 = vector.broadcast %90 : vector<1x32xf32> to vector<6x32xf32>
    %110 = arith.mulf %108, %109 : vector<6x32xf32>
    %111 = vector.broadcast %92 : vector<1x32xf32> to vector<6x32xf32>
    %112 = arith.addf %110, %111 : vector<6x32xf32>
    %c1_57 = arith.constant 1 : index
    %c0_58 = arith.constant 0 : index
    %c0_59 = arith.constant 0 : index
    %113 = vector.load %arg1[%c1_57, %c0_58, %c0_59] : memref<2x224x128xf32, #tpu.memory_space<vmem>>, vector<1x32x96xf32>
    %114 = vector.shape_cast %113 : vector<1x32x96xf32> to vector<32x96xf32>
    %cst_60 = arith.constant dense<0.000000e+00> : vector<6x96xf32>
    %115 = tpu.matmul %112, %114, %cst_60 {dimension_numbers = #tpu.dot_dimension_numbers<[1], [0], [0], [1], [0, 0, 1, 1], [], []>} : vector<6x32xf32>, vector<32x96xf32>, vector<6x96xf32> -> vector<6x96xf32>
    %c1_61 = arith.constant 1 : index
    %c0_62 = arith.constant 0 : index
    %c0_63 = arith.constant 0 : index
    %116 = vector.load %arg2[%c1_61, %c0_62, %c0_63] : memref<2x8x128xf32, #tpu.memory_space<vmem>>, vector<1x1x96xf32>
    %117 = vector.shape_cast %116 : vector<1x1x96xf32> to vector<1x96xf32>
    %118 = vector.broadcast %117 : vector<1x96xf32> to vector<6x96xf32>
    %119 = arith.addf %115, %118 : vector<6x96xf32>
    %120 = vector.extract_strided_slice %119 {offsets = [0, 0], sizes = [6, 32], strides = [1, 1]} : vector<6x96xf32> to vector<6x32xf32>
    %121 = vector.extract_strided_slice %119 {offsets = [0, 32], sizes = [6, 32], strides = [1, 1]} : vector<6x96xf32> to vector<6x32xf32>
    %122 = vector.extract_strided_slice %119 {offsets = [0, 64], sizes = [6, 32], strides = [1, 1]} : vector<6x96xf32> to vector<6x32xf32>
    %cst_64 = arith.constant dense<0.000000e+00> : vector<24x32xf32>
    %123 = tpu.matmul %1, %121, %cst_64 {dimension_numbers = #tpu.dot_dimension_numbers<[1], [0], [0], [1], [0, 0, 1, 1], [], []>} : vector<24x6xf32>, vector<6x32xf32>, vector<24x32xf32> -> vector<24x32xf32>
    %124 = arith.mulf %123, %2 : vector<24x32xf32>
    %cst_65 = arith.constant dense<0.000000e+00> : vector<24x32xf32>
    %125 = tpu.matmul %1, %122, %cst_65 {dimension_numbers = #tpu.dot_dimension_numbers<[1], [0], [0], [1], [0, 0, 1, 1], [], []>} : vector<24x6xf32>, vector<6x32xf32>, vector<24x32xf32> -> vector<24x32xf32>
    %126 = arith.mulf %125, %2 : vector<24x32xf32>
    %cst_66 = arith.constant dense<0.000000e+00> : vector<6x24xf32>
    %127 = tpu.matmul %120, %124, %cst_66 {dimension_numbers = #tpu.dot_dimension_numbers<[1], [1], [0], [0], [0, 0, 1, 0], [], []>} : vector<6x32xf32>, vector<24x32xf32>, vector<6x24xf32> -> vector<6x24xf32>
    %128 = arith.addf %127, %4 : vector<6x24xf32>
    %cst_67 = arith.constant dense<0xFF800000> : vector<6xf32>
    %129 = vector.multi_reduction <maximumf>, %128, %cst_67 [1] : vector<6x24xf32> to vector<6xf32>
    %130 = vector.shape_cast %129 : vector<6xf32> to vector<6x1xf32>
    %131 = vector.broadcast %130 : vector<6x1xf32> to vector<6x24xf32>
    %132 = arith.subf %128, %131 : vector<6x24xf32>
    %133 = math.exp %132 : vector<6x24xf32>
    %cst_68 = arith.constant dense<0.000000e+00> : vector<6x24xf32>
    %134 = tpu.matmul %133, %3, %cst_68 {dimension_numbers = #tpu.dot_dimension_numbers<[1], [0], [0], [1], [0, 0, 1, 1], [], []>} : vector<6x24xf32>, vector<24x24xf32>, vector<6x24xf32> -> vector<6x24xf32>
    %cst_69 = arith.constant 1.000000e-30 : f32
    %135 = vector.broadcast %cst_69 : f32 to vector<6x24xf32>
    %136 = arith.addf %134, %135 : vector<6x24xf32>
    %137 = tpu.reciprocal %136 {approx = true} : vector<6x24xf32> -> vector<6x24xf32>
    %138 = arith.mulf %136, %137 : vector<6x24xf32>
    %cst_70 = arith.constant 2.000000e+00 : f32
    %139 = vector.broadcast %cst_70 : f32 to vector<6x24xf32>
    %140 = arith.subf %139, %138 : vector<6x24xf32>
    %141 = arith.mulf %137, %140 : vector<6x24xf32>
    %142 = arith.mulf %133, %141 : vector<6x24xf32>
    %cst_71 = arith.constant dense<0.000000e+00> : vector<6x32xf32>
    %143 = tpu.matmul %142, %126, %cst_71 {dimension_numbers = #tpu.dot_dimension_numbers<[1], [0], [0], [1], [0, 0, 1, 1], [], []>} : vector<6x24xf32>, vector<24x32xf32>, vector<6x32xf32> -> vector<6x32xf32>
    %c1_72 = arith.constant 1 : index
    %c64_73 = arith.constant 64 : index
    %c0_74 = arith.constant 0 : index
    %144 = vector.load %arg1[%c1_72, %c64_73, %c0_74] : memref<2x224x128xf32, #tpu.memory_space<vmem>>, vector<1x32x32xf32>
    %145 = vector.shape_cast %144 : vector<1x32x32xf32> to vector<32x32xf32>
    %cst_75 = arith.constant dense<0.000000e+00> : vector<6x32xf32>
    %146 = tpu.matmul %143, %145, %cst_75 {dimension_numbers = #tpu.dot_dimension_numbers<[1], [0], [0], [1], [0, 0, 1, 1], [], []>} : vector<6x32xf32>, vector<32x32xf32>, vector<6x32xf32> -> vector<6x32xf32>
    %c1_76 = arith.constant 1 : index
    %c2_77 = arith.constant 2 : index
    %c0_78 = arith.constant 0 : index
    %147 = vector.load %arg2[%c1_76, %c2_77, %c0_78] : memref<2x8x128xf32, #tpu.memory_space<vmem>>, vector<1x1x32xf32>
    %148 = vector.shape_cast %147 : vector<1x1x32xf32> to vector<1x32xf32>
    %149 = vector.broadcast %148 : vector<1x32xf32> to vector<6x32xf32>
    %150 = arith.addf %146, %149 : vector<6x32xf32>
    %151 = arith.addf %112, %150 : vector<6x32xf32>
    %c1_79 = arith.constant 1 : index
    %c4_80 = arith.constant 4 : index
    %c0_81 = arith.constant 0 : index
    %152 = vector.load %arg2[%c1_79, %c4_80, %c0_81] : memref<2x8x128xf32, #tpu.memory_space<vmem>>, vector<1x1x32xf32>
    %153 = vector.shape_cast %152 : vector<1x1x32xf32> to vector<1x32xf32>
    %c1_82 = arith.constant 1 : index
    %c5_83 = arith.constant 5 : index
    %c0_84 = arith.constant 0 : index
    %154 = vector.load %arg2[%c1_82, %c5_83, %c0_84] : memref<2x8x128xf32, #tpu.memory_space<vmem>>, vector<1x1x32xf32>
    %155 = vector.shape_cast %154 : vector<1x1x32xf32> to vector<1x32xf32>
    %cst_85 = arith.constant dense<0.000000e+00> : vector<6xf32>
    %156 = vector.multi_reduction <add>, %151, %cst_85 [1] : vector<6x32xf32> to vector<6xf32>
    %157 = vector.shape_cast %156 : vector<6xf32> to vector<6x1xf32>
    %cst_86 = arith.constant 3.200000e+01 : f32
    %158 = vector.broadcast %cst_86 : f32 to vector<6x1xf32>
    %159 = arith.divf %157, %158 : vector<6x1xf32>
    %160 = vector.broadcast %159 : vector<6x1xf32> to vector<6x32xf32>
    %161 = arith.subf %151, %160 : vector<6x32xf32>
    %162 = arith.mulf %161, %161 : vector<6x32xf32>
    %cst_87 = arith.constant dense<0.000000e+00> : vector<6xf32>
    %163 = vector.multi_reduction <add>, %162, %cst_87 [1] : vector<6x32xf32> to vector<6xf32>
    %164 = vector.shape_cast %163 : vector<6xf32> to vector<6x1xf32>
    %cst_88 = arith.constant 3.200000e+01 : f32
    %165 = vector.broadcast %cst_88 : f32 to vector<6x1xf32>
    %166 = arith.divf %164, %165 : vector<6x1xf32>
    %cst_89 = arith.constant 9.99999974E-6 : f32
    %167 = vector.broadcast %cst_89 : f32 to vector<6x1xf32>
    %168 = arith.addf %166, %167 : vector<6x1xf32>
    %169 = math.rsqrt %168 : vector<6x1xf32>
    %170 = vector.broadcast %169 : vector<6x1xf32> to vector<6x32xf32>
    %171 = arith.mulf %161, %170 : vector<6x32xf32>
    %172 = vector.broadcast %153 : vector<1x32xf32> to vector<6x32xf32>
    %173 = arith.mulf %171, %172 : vector<6x32xf32>
    %174 = vector.broadcast %155 : vector<1x32xf32> to vector<6x32xf32>
    %175 = arith.addf %173, %174 : vector<6x32xf32>
    %c1_90 = arith.constant 1 : index
    %c32_91 = arith.constant 32 : index
    %c0_92 = arith.constant 0 : index
    %176 = vector.load %arg1[%c1_90, %c32_91, %c0_92] : memref<2x224x128xf32, #tpu.memory_space<vmem>>, vector<1x32x128xf32>
    %177 = vector.shape_cast %176 : vector<1x32x128xf32> to vector<32x128xf32>
    %cst_93 = arith.constant dense<0.000000e+00> : vector<6x128xf32>
    %178 = tpu.matmul %175, %177, %cst_93 {dimension_numbers = #tpu.dot_dimension_numbers<[1], [0], [0], [1], [0, 0, 1, 1], [], []>} : vector<6x32xf32>, vector<32x128xf32>, vector<6x128xf32> -> vector<6x128xf32>
    %c1_94 = arith.constant 1 : index
    %c1_95 = arith.constant 1 : index
    %c0_96 = arith.constant 0 : index
    %179 = vector.load %arg2[%c1_94, %c1_95, %c0_96] : memref<2x8x128xf32, #tpu.memory_space<vmem>>, vector<1x1x128xf32>
    %180 = vector.shape_cast %179 : vector<1x1x128xf32> to vector<1x128xf32>
    %181 = vector.broadcast %180 : vector<1x128xf32> to vector<6x128xf32>
    %182 = arith.addf %178, %181 : vector<6x128xf32>
    %cst_97 = arith.constant 0.000000e+00 : f32
    %183 = vector.broadcast %cst_97 : f32 to vector<6x128xf32>
    %184 = arith.maximumf %182, %183 : vector<6x128xf32>
    %c1_98 = arith.constant 1 : index
    %c96_99 = arith.constant 96 : index
    %c0_100 = arith.constant 0 : index
    %185 = vector.load %arg1[%c1_98, %c96_99, %c0_100] : memref<2x224x128xf32, #tpu.memory_space<vmem>>, vector<1x128x32xf32>
    %186 = vector.shape_cast %185 : vector<1x128x32xf32> to vector<128x32xf32>
    %cst_101 = arith.constant dense<0.000000e+00> : vector<6x32xf32>
    %187 = tpu.matmul %184, %186, %cst_101 {dimension_numbers = #tpu.dot_dimension_numbers<[1], [0], [0], [1], [0, 0, 1, 1], [], []>} : vector<6x128xf32>, vector<128x32xf32>, vector<6x32xf32> -> vector<6x32xf32>
    %c1_102 = arith.constant 1 : index
    %c3_103 = arith.constant 3 : index
    %c0_104 = arith.constant 0 : index
    %188 = vector.load %arg2[%c1_102, %c3_103, %c0_104] : memref<2x8x128xf32, #tpu.memory_space<vmem>>, vector<1x1x32xf32>
    %189 = vector.shape_cast %188 : vector<1x1x32xf32> to vector<1x32xf32>
    %190 = vector.broadcast %189 : vector<1x32xf32> to vector<6x32xf32>
    %191 = arith.addf %187, %190 : vector<6x32xf32>
    %192 = arith.addf %175, %191 : vector<6x32xf32>
    %c1_105 = arith.constant 1 : index
    %c6_106 = arith.constant 6 : index
    %c0_107 = arith.constant 0 : index
    %193 = vector.load %arg2[%c1_105, %c6_106, %c0_107] : memref<2x8x128xf32, #tpu.memory_space<vmem>>, vector<1x1x32xf32>
    %194 = vector.shape_cast %193 : vector<1x1x32xf32> to vector<1x32xf32>
    %c1_108 = arith.constant 1 : index
    %c7_109 = arith.constant 7 : index
    %c0_110 = arith.constant 0 : index
    %195 = vector.load %arg2[%c1_108, %c7_109, %c0_110] : memref<2x8x128xf32, #tpu.memory_space<vmem>>, vector<1x1x32xf32>
    %196 = vector.shape_cast %195 : vector<1x1x32xf32> to vector<1x32xf32>
    %cst_111 = arith.constant dense<0.000000e+00> : vector<6xf32>
    %197 = vector.multi_reduction <add>, %192, %cst_111 [1] : vector<6x32xf32> to vector<6xf32>
    %198 = vector.shape_cast %197 : vector<6xf32> to vector<6x1xf32>
    %cst_112 = arith.constant 3.200000e+01 : f32
    %199 = vector.broadcast %cst_112 : f32 to vector<6x1xf32>
    %200 = arith.divf %198, %199 : vector<6x1xf32>
    %201 = vector.broadcast %200 : vector<6x1xf32> to vector<6x32xf32>
    %202 = arith.subf %192, %201 : vector<6x32xf32>
    %203 = arith.mulf %202, %202 : vector<6x32xf32>
    %cst_113 = arith.constant dense<0.000000e+00> : vector<6xf32>
    %204 = vector.multi_reduction <add>, %203, %cst_113 [1] : vector<6x32xf32> to vector<6xf32>
    %205 = vector.shape_cast %204 : vector<6xf32> to vector<6x1xf32>
    %cst_114 = arith.constant 3.200000e+01 : f32
    %206 = vector.broadcast %cst_114 : f32 to vector<6x1xf32>
    %207 = arith.divf %205, %206 : vector<6x1xf32>
    %cst_115 = arith.constant 9.99999974E-6 : f32
    %208 = vector.broadcast %cst_115 : f32 to vector<6x1xf32>
    %209 = arith.addf %207, %208 : vector<6x1xf32>
    %210 = math.rsqrt %209 : vector<6x1xf32>
    %211 = vector.broadcast %210 : vector<6x1xf32> to vector<6x32xf32>
    %212 = arith.mulf %202, %211 : vector<6x32xf32>
    %213 = vector.broadcast %194 : vector<1x32xf32> to vector<6x32xf32>
    %214 = arith.mulf %212, %213 : vector<6x32xf32>
    %215 = vector.broadcast %196 : vector<1x32xf32> to vector<6x32xf32>
    %216 = arith.addf %214, %215 : vector<6x32xf32>
    %c168 = arith.constant 168 : index
    %c0_116 = arith.constant 0 : index
    %217 = vector.load %arg3[%c168, %c0_116] : memref<192x128xf32, #tpu.memory_space<vmem>>, vector<2x6xf32>
    %cst_117 = arith.constant dense<0.000000e+00> : vector<2x32xf32>
    %218 = tpu.matmul %217, %216, %cst_117 {dimension_numbers = #tpu.dot_dimension_numbers<[1], [0], [0], [1], [0, 0, 1, 1], [], []>} : vector<2x6xf32>, vector<6x32xf32>, vector<2x32xf32> -> vector<2x32xf32>
    %c176 = arith.constant 176 : index
    %c0_118 = arith.constant 0 : index
    %219 = vector.load %arg3[%c176, %c0_118] : memref<192x128xf32, #tpu.memory_space<vmem>>, vector<2x6xf32>
    %cst_119 = arith.constant dense<0.000000e+00> : vector<2x32xf32>
    %220 = tpu.matmul %219, %216, %cst_119 {dimension_numbers = #tpu.dot_dimension_numbers<[1], [0], [0], [1], [0, 0, 1, 1], [], []>} : vector<2x6xf32>, vector<6x32xf32>, vector<2x32xf32> -> vector<2x32xf32>
    %c16 = arith.constant 16 : index
    %c0_120 = arith.constant 0 : index
    %221 = vector.load %arg3[%c16, %c0_120] : memref<192x128xf32, #tpu.memory_space<vmem>>, vector<32x128xf32>
    %cst_121 = arith.constant dense<0.000000e+00> : vector<2x128xf32>
    %222 = tpu.matmul %218, %221, %cst_121 {dimension_numbers = #tpu.dot_dimension_numbers<[1], [0], [0], [1], [0, 0, 1, 1], [], []>} : vector<2x32xf32>, vector<32x128xf32>, vector<2x128xf32> -> vector<2x128xf32>
    %c48 = arith.constant 48 : index
    %c0_122 = arith.constant 0 : index
    %223 = vector.load %arg3[%c48, %c0_122] : memref<192x128xf32, #tpu.memory_space<vmem>>, vector<32x128xf32>
    %cst_123 = arith.constant dense<0.000000e+00> : vector<2x128xf32>
    %224 = tpu.matmul %220, %223, %cst_123 {dimension_numbers = #tpu.dot_dimension_numbers<[1], [0], [0], [1], [0, 0, 1, 1], [], []>} : vector<2x32xf32>, vector<32x128xf32>, vector<2x128xf32> -> vector<2x128xf32>
    %225 = arith.addf %222, %224 : vector<2x128xf32>
    %c184 = arith.constant 184 : index
    %c0_124 = arith.constant 0 : index
    %226 = vector.load %arg3[%c184, %c0_124] : memref<192x128xf32, #tpu.memory_space<vmem>>, vector<1x128xf32>
    %227 = vector.broadcast %226 : vector<1x128xf32> to vector<2x128xf32>
    %228 = arith.addf %225, %227 : vector<2x128xf32>
    %c0_125 = arith.constant 0 : index
    %c0_126 = arith.constant 0 : index
    %229 = vector.load %arg4[%c0_125, %c0_126] : memref<2x128xf32, #tpu.memory_space<vmem>>, vector<2x128xf32>
    tpu.vector_store %arg4[%c0_125, %c0_126], %228 {strides = array<i32>} : memref<2x128xf32, #tpu.memory_space<vmem>>, vector<2x128xf32>,
    return
  }
}

</mosaic_0001>

<bundles_post_ra>
// kernel: tpu_custom_call.1
= control target key start
LH: loop header
LB: loop body
LE: loop exit
PB: predicated region body
PF: predicated region fallthrough
CT: control target
= control target key end

     0   :  { %9 = vsyncpa [#allocation3], 0  ;;  %s3030_s0 = inlined_call_operand.hbm [shape: f32[6,14], index: 0, kind: input, shape index: {}]   ;;  %s3031_s1 = inlined_call_operand.hbm [shape: f32[2,224,128], index: 1, kind: input, shape index: {}]   ;;  %s3032_s2 = inlined_call_operand.hbm [shape: f32[2,8,128], index: 2, kind: input, shape index: {}]   ;;  %s3033_s3 = inlined_call_operand.hbm [shape: f32[192,128], index: 3, kind: input, shape index: {}]   ;;  %s3034_s4 = inlined_call_operand.hbm [shape: f32[2,128], index: 4, kind: output, shape index: {}]  }
   0x1   :  { %10 = vsyncpa [#allocation6], 0 }
   0x2   :  { %11 = vsyncpa [#allocation9], 0 }
   0x3   :  { %12 = vsyncpa [#allocation4], 0  ;;  %s2703_s15 = smov [#allocation5]  }
   0x4   :  { %s28_s16 = sshll.u32 %s2703_s15, 4  ;;  %s29_s16 = int_to_ptr.vmem [resolvable:$true] %s28_s16 }
   0x5   :  { %s2603_s17 = scalar_lea.vmem %s29_s16, 7168  ;;  %p2608_p1 = scmp.lt.s32.totalorder %s29_s16, %s29_s16 }
   0x6   :  { %p2604_p0 = scmp.ne.s32.totalorder %s29_s16, %s2603_s17  ;;  %p2609_p2 = scmp.lt.s32.totalorder %s2603_s17, %s2603_s17 }
   0x8   :  { %p2610_p3 = por %p2609_p2, %p2608_p1 }
   0xa   :  { %p2611_p4 = pnand %p2610_p3, %p2604_p0 }
   0xc   :  { %2614 = shalt.err (!%p2611_p4)
}
   0xd   :  { %s2704_s18 = smov 128   ;;  %s2705_s19 = smov 8  }
   0xe   :  { %34 = dma.hbm_to_vmem [thread:$0]  %s3031_s1, 7168, %s29_s16, [#allocation6], %s2704_s18, %s2704_s18, %s2705_s19  }
   0xf   :  { %s2706_s22 = smov [#allocation2]   ;;  %s2707_s24 = smov [#allocation7]  }
  0x10   :  { %s19_s23 = sshll.u32 %s2706_s22, 4  ;;  %s40_s25 = sshll.u32 %s2707_s24, 4  ;;  %s20_s23 = int_to_ptr.vmem [resolvable:$true] %s19_s23  ;;  %s41_s25 = int_to_ptr.vmem [resolvable:$true] %s40_s25 }
  0x11   :  { %s2623_s26 = scalar_lea.vmem %s20_s23, 128  ;;  %p2628_p6 = scmp.lt.s32.totalorder %s20_s23, %s20_s23 }
  0x12   :  { %p2624_p5 = scmp.ne.s32.totalorder %s20_s23, %s2623_s26  ;;  %p2629_p7 = scmp.lt.s32.totalorder %s2623_s26, %s2623_s26 }
  0x14   :  { %p2630_p8 = por %p2629_p7, %p2628_p6 }
  0x16   :  { %p2631_p9 = pnand %p2630_p8, %p2624_p5 }
  0x18   :  { %2634 = shalt.err (!%p2631_p9)
}
  0x19   :  { %22 = dma.hbm_to_vmem [thread:$0]  %s3030_s0, 128, %s20_s23, [#allocation3]  }
  0x1a   :  { %s2643_s29 = scalar_lea.vmem %s41_s25, 256  ;;  %p2648_p11 = scmp.lt.s32.totalorder %s41_s25, %s41_s25 }
  0x1b   :  { %p2644_p10 = scmp.ne.s32.totalorder %s41_s25, %s2643_s29  ;;  %p2649_p12 = scmp.lt.s32.totalorder %s2643_s29, %s2643_s29 }
  0x1d   :  { %p2650_p13 = por %p2649_p12, %p2648_p11 }
  0x1f   :  { %p2651_p0 = pnand %p2650_p13, %p2644_p10 }
  0x21   :  { %2654 = shalt.err (!%p2651_p0)
}
  0x22   :  { %46 = dma.hbm_to_vmem [thread:$0]  %s3032_s2, 256, %s41_s25, [#allocation6], %s2704_s18, %s2704_s18, %s2705_s19  }
  0x23   :  { %s2708_s5 = smov [#allocation8]  }
  0x24   :  { %s52_s6 = sshll.u32 %s2708_s5, 4  ;;  %s53_s6 = int_to_ptr.vmem [resolvable:$true] %s52_s6 }
  0x25   :  { %s2663_s7 = scalar_lea.vmem %s53_s6, 3072  ;;  %p2668_p2 = scmp.lt.s32.totalorder %s53_s6, %s53_s6 }
  0x26   :  { %p2664_p1 = scmp.ne.s32.totalorder %s53_s6, %s2663_s7  ;;  %p2669_p3 = scmp.lt.s32.totalorder %s2663_s7, %s2663_s7 }
  0x28   :  { %p2670_p4 = por %p2669_p3, %p2668_p2 }
  0x2a   :  { %p2671_p5 = pnand %p2670_p4, %p2664_p1 }
  0x2c   :  { %2674 = shalt.err (!%p2671_p5)
}
  0x2d   :  { %58 = dma.hbm_to_vmem [thread:$0]  %s3033_s3, 3072, %s53_s6, [#allocation9], %s2704_s18, %s2704_s18, %s2705_s19  }
  0x2e   :  { %2695 = dma.done.wait [#allocation3], 128  }
  0x2f   :  { %2696 = vsyncadd [#allocation3], 4294967168 }
  0x30   :  { %2697 = dma.done.wait [#allocation6], 7424  }
  0x31   :  { %2698 = vsyncadd [#allocation6], 4294959872 }
  0x32   :  { %2699 = dma.done.wait [#allocation9], 3072  }
  0x33   :  { %2700 = vsyncadd [#allocation9], 4294964224  ;;  %v2709_v0 = vmov 0.0   ;;  %vm2710_vm0 = vmmov 0   ;;  %vm89_vm1 = vcmask 1045504   ;;  %v71_v2 = vld [vmem:[#allocation8] sm:$0xff] }
  0x34   :  { %2295 = vmatprep.subr.mxu0 %v2709_v0  ;;  %2299 = vmatprep.mubr.msk.f32.mxu0 %vm2710_vm0, %v2709_v0  ;;  %v72_v1 = vld [vmem:[#allocation8 + $0x8] sm:$0x3f]  ;;  %vm85_vm2 = vcmask 113664   ;;  %v165_v5 = vld [vmem:[#allocation5 + $0x10] sm:$0xff]  ;;  %v164_v6 = vld [vmem:[#allocation5 + $0x8] sm:$0xff]  ;;  %vm172_vm3 = vcmask 261120  }
  0x35   :  { %2302 = vmatprep.subr.mxu1 %v2709_v0  ;;  %2310 = vmatprep.mubr.msk.f32.mxu1 %vm2710_vm0, %v2709_v0  ;;  %v84_v3 = vld [vmem:[#allocation2] sm:$0x3f]  ;;  %v163_v7 = vld [vmem:[#allocation5] sm:$0xff]  ;;  %v83_v8 = vld [vmem:[#allocation8 + $0xa0] sm:$0x3f]  ;;  %s2711_s2 = smov 64  }
  0x36   :  { %2296 = vmatpush3.msk.msra.mxu0 %vm89_vm1, %v72_v1  ;;  %v166_v4 = vld [vmem:[#allocation5 + $0x18] sm:$0xff]  ;;  %v2117_v12 = vld [vmem:[#allocation7] ss:$0 sm:$0xff]  ;;  %s2712_s3 = smov 96   ;;  %vm249_vm4 = vcmask 48128   ;;  %v2792_v19 = vld [vmem:[#allocation8 + $0x58] sm:$0xff] }
  0x37   :  { %2297 = vmatprep.subr.mxu0 %v2709_v0  ;;  %2303 = vmatpush3.msra.mxu1 %v166_v4  ;;  %v2783_v16 = vld [vmem:[#allocation8 + $0x50] sm:$0xff]  ;;  %v2803_v20 = vld [vmem:[#allocation8 + $0x60] sm:$0xff]  ;;  %v2817_v25 = vld [vmem:[#allocation8 + $0x78] sm:$0xff]  ;;  %vm512_vm5 = vcmask 193536   ;;  %vm519_vm6 = vcmask 195584   ;;  %vm756_vm7 = vcmask 259072  }
  0x38   :  { %2298 = vmatpush3.msra.mxu0 %v71_v2  ;;  %2304 = vmatprep.subr.mxu1 %v2709_v0  ;;  %v2820_v28 = vld [vmem:[#allocation8 + $0x70] sm:$0xff]  ;;  %v2825_v31 = vld [vmem:[#allocation8 + $0x68] sm:$0xff]  ;;  %v2835_v33 = vld [vmem:[#allocation8 + $0x98] sm:$0x3f]  ;;  %s2713_s9 = smov [#allocation10]  }
  0x39   :  { %2300 = vmatmul.mubr.msk.f32.vlgmr.msra.gmra.mxu0 %vm85_vm2, %v84_v3  ;;  %2305 = vmatpush3.msra.mxu1 %v165_v5  ;;  %v2839_v38 = vld [vmem:[#allocation8 + $0x90] sm:$0xff]  ;;  %v2841_v39 = vld [vmem:[#allocation8 + $0x88] sm:$0xff]  ;;  %v2845_v40 = vld [vmem:[#allocation8 + $0x80] sm:$0xff]  ;;  %s2104_s10 = sshll.u32 %s2713_s9, 4  ;;  %s2105_s10 = int_to_ptr.vmem [resolvable:$true] %s2104_s10 }
  0x3a   :  { %2306 = vmatprep.subr.mxu1 %v2709_v0  ;;  %2313 = vmatprep.subr.mxu0 %v2709_v0  ;;  %v674_v54 = vld [vmem:[#allocation5 + $0x58] sm:$0xff]  ;;  %v673_v55 = vld [vmem:[#allocation5 + $0x50] sm:$0xff]  ;;  %v672_v56 = vld [vmem:[#allocation5 + $0x48] sm:$0xff]  ;;  %s2675_s11 = scalar_lea.vmem %s2105_s10, 32  ;;  %p2680_p7 = scmp.lt.s32.totalorder %s2105_s10, %s2105_s10 }
  0x3b   :  { %2315 = vmatprep.mubr.msk.f32.mxu0 %vm2710_vm0, %v2709_v0  ;;  %2307 = vmatpush3.msra.mxu1 %v164_v6  ;;  %v671_v2 = vld [vmem:[#allocation5 + $0x40] sm:$0xff]  ;;  %p2676_p6 = scmp.ne.s32.totalorder %s2105_s10, %s2675_s11  ;;  %p2681_p8 = scmp.lt.s32.totalorder %s2675_s11, %s2675_s11 }
  0x3c   :  { %2308 = vmatprep.subr.mxu1 %v2709_v0  ;;  %v2133_v5 = vld [vmem:[#allocation7 + $0x2] ss:$0 sm:$0xff] }
  0x3d   :  { %2309 = vmatpush3.msra.mxu1 %v163_v7  ;;  %p2682_p9 = por %p2681_p8, %p2680_p7 }
  0x3e   :  { %2324 = vmatprep.subr.mxu1 %v2709_v0 }
  0x3f   :  { %p2683_p10 = pnand %p2682_p9, %p2676_p6 }
  0xf9   :  { %v159_v9 = vpop.f32.mrf.mxu0 }
  0xfa   :  { %v2775_v10 = vadd.f32 %v159_v9, %v83_v8 }
  0xfb   :  { %v2301_v11 = vpop.f32.mrf.mxu0 }
  0xfc   :  { %2311 = vmatmul.mubr.msk.f32.vlgmr.msra.gmra.mxu1 %vm172_vm3, %v2775_v10 }
  0xfd   :  { %2326 = vmatprep.mubr.msk.f32.mxu1 %vm2710_vm0, %v2709_v0 }
 0x1bc   :  { %v242_v13 = vpop.f32.mrf.mxu1 }
 0x1bd   :  { %v243_v14 = vadd.f32 %v2117_v12, %v242_v13 }
 0x1be   :  { %v2312_v15 = vpop.f32.mrf.mxu1 }
 0x1bf   :  { %344 = vrot.lane.b32.xlu1 %v243_v14, %s2711_s2  ;;  %247 = vrot.lane.b32.xlu0 %v243_v14, %s2712_s3 }
 0x231   :  { %v345_v17 = vpop.permute.xlu1 %344  ;;  %v248_v18 = vpop.permute.xlu0 %247 }
 0x232   :  { %2314 = vmatpush3.msk.msra.mxu0 %vm89_vm1, %v248_v18  ;;  %2325 = vmatpush3.msk.msra.mxu1 %vm89_vm1, %v345_v17  ;;  %v784_v18 = vld [vmem:[#allocation5 + $0x38] sm:$0xff] }
 0x233   :  { %2316 = vmatmul.mubr.msk.f32.vlgmr.msra.gmra.mxu0 %vm249_vm4, %v2783_v16  ;;  %2335 = vmatprep.subr.mxu0 %v2709_v0 }
 0x234   :  { %2318 = vmatprep.mubr.msk.f32.mxu0 %vm2710_vm0, %v2709_v0  ;;  %2327 = vmatmul.mubr.msk.f32.vlgmr.msra.gmra.mxu1 %vm249_vm4, %v2783_v16 }
 0x235   :  { %2329 = vmatprep.mubr.msk.f32.mxu1 %vm2710_vm0, %v2709_v0  ;;  %2344 = vmatprep.subr.mxu1 %v2709_v0 }
 0x236   :  { %2345 = vmatpush3.msra.mxu1 %v2839_v38 }
 0x237   :  { %2319 = vmatmul.mubr.msk.f32.gmra.mxu0 %vm249_vm4, %v2792_v19  ;;  %2346 = vmatprep.subr.mxu1 %v2709_v0 }
 0x238   :  { %2321 = vmatprep.mubr.msk.f32.mxu0 %vm2710_vm0, %v2709_v0  ;;  %2330 = vmatmul.mubr.msk.f32.gmra.mxu1 %vm249_vm4, %v2792_v19 }
 0x239   :  { %2332 = vmatprep.mubr.msk.f32.mxu1 %vm2710_vm0, %v2709_v0  ;;  %2347 = vmatpush3.msra.mxu1 %v2841_v39 }
 0x23a   :  { %2348 = vmatprep.subr.mxu1 %v2709_v0 }
 0x23b   :  { %2322 = vmatmul.mubr.msk.f32.gmra.mxu0 %vm249_vm4, %v2803_v20  ;;  %2349 = vmatpush3.msra.mxu1 %v2845_v40 }
 0x23c   :  { %2341 = vmatprep.mubr.msk.f32.mxu0 %vm2710_vm0, %v2709_v0  ;;  %2333 = vmatmul.mubr.msk.f32.gmra.mxu1 %vm249_vm4, %v2803_v20 }
 0x23d   :  { %2350 = vmatprep.mubr.msk.f32.mxu1 %vm2710_vm0, %v2709_v0  ;;  %2362 = vmatprep.subr.mxu1 %v2709_v0 }
 0x2f3   :  { %v327_v21 = vpop.f32.mrf.mxu0 }
 0x2f4   :  { %v341_v32 = vmul.f32 %v327_v21, %v2825_v31  ;;  %v414_v41 = vpop.f32.mrf.mxu1  ;;  %v783_v21 = vld [vmem:[#allocation5 + $0x30] sm:$0xff] }
 0x2f5   :  { %v2317_v22 = vpop.f32.mrf.mxu0  ;;  %v428_v49 = vmul.f32 %v414_v41, %v2825_v31  ;;  %v868_v41 = vld [vmem:[#allocation5 + $0x80] sm:$0xff] }
 0x2f6   :  { %v2328_v42 = vpop.f32.mrf.mxu1  ;;  %v782_v22 = vld [vmem:[#allocation5 + $0x28] sm:$0xff] }
 0x2f7   :  { %v332_v23 = vpop.f32.mrf.mxu0  ;;  %v867_v42 = vld [vmem:[#allocation5 + $0x78] sm:$0xff] }
 0x2f8   :  { %v342_v30 = vmul.f32 %v332_v23, %v2820_v28  ;;  %v419_v43 = vpop.f32.mrf.mxu1  ;;  %v879_v23 = vld [vmem:[#allocation5 + $0xd8] sm:$0xff] }
 0x2f9   :  { %v2320_v24 = vpop.f32.mrf.mxu0  ;;  %v429_v46 = vmul.f32 %v419_v43, %v2820_v28 }
 0x2fa   :  { %v2331_v44 = vpop.f32.mrf.mxu1  ;;  %v878_v24 = vld [vmem:[#allocation5 + $0xd0] sm:$0xff] }
 0x2fb   :  { %v337_v26 = vpop.f32.mrf.mxu0 }
 0x2fc   :  { %v343_v27 = vmul.f32 %v337_v26, %v2817_v25  ;;  %v424_v45 = vpop.f32.mrf.mxu1  ;;  %v877_v26 = vld [vmem:[#allocation5 + $0xc8] sm:$0xff] }
 0x2fd   :  { %v2323_v29 = vpop.f32.mrf.mxu0  ;;  %v430_v47 = vmul.f32 %v424_v45, %v2817_v25 }
 0x2fe   :  { %2336 = vmatpush3.xpose.msk.msra.mxu0 %vm172_vm3, %v343_v27  ;;  %v2334_v48 = vpop.f32.mrf.mxu1  ;;  %v876_v27 = vld [vmem:[#allocation5 + $0xc0] sm:$0xff]  ;;  %v875_v29 = vld [vmem:[#allocation5 + $0xb8] sm:$0xff] }
 0x2ff   :  { %2337 = vmatprep.subr.mxu0 %v2709_v0 }
 0x302   :  { %2338 = vmatpush3.xpose.msk.msra.mxu0 %vm172_vm3, %v342_v30  ;;  %v874_v30 = vld [vmem:[#allocation5 + $0xb0] sm:$0xff] }
 0x303   :  { %2339 = vmatprep.subr.mxu0 %v2709_v0 }
 0x306   :  { %2340 = vmatpush3.xpose.msk.msra.mxu0 %vm172_vm3, %v341_v32  ;;  %v873_v32 = vld [vmem:[#allocation5 + $0xa8] sm:$0xff] }
 0x307   :  { %2353 = vmatprep.subr.mxu0 %v2709_v0 }
 0x309   :  { %2342 = vmatmul.mubr.msk.f32.vlgmr.msra.gmra.mxu0 %vm172_vm3, %v243_v14 }
 0x30a   :  { %2359 = vmatprep.mubr.msk.f32.mxu0 %vm2710_vm0, %v2709_v0  ;;  %2354 = vmatpush3.msra.mxu0 %v430_v47  ;;  %v2135_v47 = vld [vmem:[#allocation7 + $0x4] ss:$0 sm:$0xff] }
 0x30b   :  { %2355 = vmatprep.subr.mxu0 %v2709_v0 }
 0x30c   :  { %2356 = vmatpush3.msra.mxu0 %v429_v46 }
 0x30d   :  { %2357 = vmatprep.subr.mxu0 %v2709_v0 }
 0x30e   :  { %2358 = vmatpush3.msra.mxu0 %v428_v49  ;;  %v2136_v49 = vld [vmem:[#allocation7 + $0x5] ss:$0 sm:$0xff] }
 0x30f   :  { %2373 = vmatprep.subr.mxu0 %v2709_v0 }
 0x3c9   :  { %v508_v34 = vpop.f32.mrf.mxu0 }
 0x3ca   :  { %v509_v35 = vadd.f32 %v508_v34, %v2835_v33  ;;  %v872_v34 = vld [vmem:[#allocation5 + $0xa0] sm:$0xff] }
 0x3cb   :  { %v2343_v36 = vpop.f32.mrf.mxu0 }
 0x3cc   :  { %v513_v37 = vsel %vm512_vm5, %v509_v35, -inf  ;;  %v870_v36 = vld [vmem:[#allocation5 + $0x90] sm:$0xff] }
 0x3cd   :  { %514 = vmax.xlane.f32.xlu0 %v513_v37  ;;  %v869_v37 = vld [vmem:[#allocation5 + $0x88] sm:$0xff] }
 0x456   :  { %v515_v50 = vpop.xlane.xlu0 %514 }
 0x457   :  { %v516_v51 = vsub.f32 %v509_v35, %v515_v50  ;;  %v871_v35 = vld [vmem:[#allocation5 + $0x98] sm:$0xff] }
 0x459   :  { %v517_v52 = vmul.f32 1.442695, %v516_v51 }
 0x45b   :  { %2579 = vpow2.f32 %v517_v52  ;;  %v866_v52 = vld [vmem:[#allocation5 + $0x70] sm:$0xff] }
 0x468   :  { %v2580_v53 = vpop.eup %2579 }
 0x469   :  { %2351 = vmatmul.mubr.msk.f32.vlgmr.msra.gmra.mxu1 %vm519_vm6, %v2580_v53 }
 0x46a   :  { %2370 = vmatprep.mubr.msk.f32.mxu1 %vm2710_vm0, %v2709_v0  ;;  %2363 = vmatpush3.msra.mxu1 %v674_v54  ;;  %v864_v54 = vld [vmem:[#allocation5 + $0x60] sm:$0xff] }
 0x46b   :  { %2364 = vmatprep.subr.mxu1 %v2709_v0 }
 0x46c   :  { %2365 = vmatpush3.msra.mxu1 %v673_v55  ;;  %v2137_v55 = vld [vmem:[#allocation7 + $0x1] ss:$0 sm:$0xff] }
 0x46d   :  { %2366 = vmatprep.subr.mxu1 %v2709_v0 }
 0x46e   :  { %2367 = vmatpush3.msra.mxu1 %v672_v56 }
 0x46f   :  { %2368 = vmatprep.subr.mxu1 %v2709_v0 }
 0x470   :  { %2369 = vmatpush3.msra.mxu1 %v671_v2 }
 0x471   :  { %2384 = vmatprep.subr.mxu1 %v2709_v0 }
 0x529   :  { %v589_v57 = vpop.f32.mrf.mxu1 }
 0x52a   :  { %v590_v58 = vadd.f32 1e-30, %v589_v57 }
 0x52b   :  { %v2352_v59 = vpop.f32.mrf.mxu1 }
 0x52c   :  { %2581 = vrcp.f32 %v590_v58 }
 0x539   :  { %v2582_v60 = vpop.eup %2581 }
 0x53a   :  { %v594_v61 = vmul.f32 %v2582_v60, %v590_v58 }
 0x53c   :  { %v595_v62 = vsub.f32 2.0, %v594_v61 }
 0x53e   :  { %v596_v63 = vmul.f32 %v2582_v60, %v595_v62  ;;  %v2139_v60 = vld [vmem:[#allocation7 + $0x3] ss:$0 sm:$0xff] }
 0x540   :  { %v597_v1 = vmul.f32 %v2580_v53, %v596_v63  ;;  %v865_v53 = vld [vmem:[#allocation5 + $0x68] sm:$0xff] }
 0x542   :  { %2360 = vmatmul.mubr.msk.f32.vlgmr.msra.gmra.mxu0 %vm519_vm6, %v597_v1 }
 0x543   :  { %2381 = vmatprep.mubr.msk.f32.mxu0 %vm2710_vm0, %v2709_v0  ;;  %2374 = vmatpush3.msra.mxu0 %v784_v18 }
 0x544   :  { %2375 = vmatprep.subr.mxu0 %v2709_v0 }
 0x545   :  { %2376 = vmatpush3.msra.mxu0 %v783_v21 }
 0x546   :  { %2377 = vmatprep.subr.mxu0 %v2709_v0 }
 0x547   :  { %2378 = vmatpush3.msra.mxu0 %v782_v22  ;;  %v2142_v22 = vld [vmem:[#allocation7 + $0x8] ss:$0 sm:$0xff] }
 0x548   :  { %2379 = vmatprep.subr.mxu0 %v2709_v0 }
 0x602   :  { %v667_v3 = vpop.f32.mrf.mxu0 }
 0x603   :  { %2371 = vmatmul.mubr.msk.f32.vlgmr.msra.gmra.mxu1 %vm172_vm3, %v667_v3 }
 0x604   :  { %v2361_v4 = vpop.f32.mrf.mxu0  ;;  %2416 = vmatprep.mubr.msk.f32.mxu1 %vm2710_vm0, %v2709_v0  ;;  %2385 = vmatpush3.msra.mxu1 %v879_v23 }
 0x605   :  { %2386 = vmatprep.subr.mxu1 %v2709_v0 }
 0x606   :  { %2387 = vmatpush3.msra.mxu1 %v878_v24 }
 0x607   :  { %2388 = vmatprep.subr.mxu1 %v2709_v0 }
 0x608   :  { %2389 = vmatpush3.msra.mxu1 %v877_v26 }
 0x609   :  { %2390 = vmatprep.subr.mxu1 %v2709_v0 }
 0x60a   :  { %2391 = vmatpush3.msra.mxu1 %v876_v27 }
 0x60b   :  { %2392 = vmatprep.subr.mxu1 %v2709_v0 }
 0x60c   :  { %2393 = vmatpush3.msra.mxu1 %v875_v29 }
 0x60d   :  { %2394 = vmatprep.subr.mxu1 %v2709_v0 }
 0x60e   :  { %2395 = vmatpush3.msra.mxu1 %v874_v30 }
 0x60f   :  { %2396 = vmatprep.subr.mxu1 %v2709_v0 }
 0x610   :  { %2397 = vmatpush3.msra.mxu1 %v873_v32 }
 0x611   :  { %2398 = vmatprep.subr.mxu1 %v2709_v0 }
 0x612   :  { %2399 = vmatpush3.msra.mxu1 %v872_v34 }
 0x613   :  { %2400 = vmatprep.subr.mxu1 %v2709_v0 }
 0x614   :  { %2401 = vmatpush3.msra.mxu1 %v871_v35 }
 0x615   :  { %2402 = vmatprep.subr.mxu1 %v2709_v0 }
 0x616   :  { %2403 = vmatpush3.msra.mxu1 %v870_v36 }
 0x617   :  { %2404 = vmatprep.subr.mxu1 %v2709_v0 }
 0x618   :  { %2405 = vmatpush3.msra.mxu1 %v869_v37 }
 0x619   :  { %2406 = vmatprep.subr.mxu1 %v2709_v0 }
 0x61a   :  { %2407 = vmatpush3.msra.mxu1 %v868_v41 }
 0x61b   :  { %2408 = vmatprep.subr.mxu1 %v2709_v0 }
 0x61c   :  { %2409 = vmatpush3.msra.mxu1 %v867_v42 }
 0x61d   :  { %2410 = vmatprep.subr.mxu1 %v2709_v0 }
 0x61e   :  { %2411 = vmatpush3.msra.mxu1 %v866_v52 }
 0x61f   :  { %2412 = vmatprep.subr.mxu1 %v2709_v0 }
 0x620   :  { %2413 = vmatpush3.msra.mxu1 %v865_v53 }
 0x621   :  { %2414 = vmatprep.subr.mxu1 %v2709_v0 }
 0x622   :  { %2415 = vmatpush3.msra.mxu1 %v864_v54  ;;  %v1481_v54 = vld [vmem:[#allocation5 + $0x138] sm:$0xff] }
 0x623   :  { %2461 = vmatprep.subr.mxu1 %v2709_v0 }
 0x6c3   :  { %v749_v6 = vpop.f32.mrf.mxu1 }
 0x6c4   :  { %v750_v7 = vadd.f32 %v2133_v5, %v749_v6  ;;  %v985_v6 = vld [vmem:[#allocation5 + $0xf8] sm:$0xff] }
 0x6c5   :  { %v2372_v8 = vpop.f32.mrf.mxu1 }
 0x6c6   :  { %v753_v9 = vadd.f32 %v750_v7, %v2775_v10  ;;  %v781_v10 = vld [vmem:[#allocation5 + $0x20] sm:$0xff]  ;;  %v983_v7 = vld [vmem:[#allocation5 + $0xe8] sm:$0xff] }
 0x6c7   :  { %2380 = vmatpush3.msra.mxu0 %v781_v10  ;;  %v982_v8 = vld [vmem:[#allocation5 + $0xe0] sm:$0xff] }
 0x6c8   :  { %v757_v11 = vsel %vm756_vm7, %v753_v9, 0.0  ;;  %2419 = vmatprep.subr.mxu0 %v2709_v0 }
 0x6c9   :  { %758 = vadd.xlane.f32.xlu1 %v757_v11 }
 0x752   :  { %v759_v12 = vpop.xlane.xlu1 %758 }
 0x753   :  { %v761_v13 = vmul.f32 0.03125, %v759_v12 }
 0x755   :  { %v762_v14 = vsub.f32 %v753_v9, %v761_v13 }
 0x757   :  { %v763_v15 = vmul.f32 %v762_v14, %v762_v14 }
 0x759   :  { %v764_v17 = vsel %vm756_vm7, %v763_v15, 0.0 }
 0x75a   :  { %765 = vadd.xlane.f32.xlu0 %v764_v17  ;;  %v2141_v17 = vld [vmem:[#allocation7 + $0x7] ss:$0 sm:$0xff] }
 0x7e3   :  { %v766_v43 = vpop.xlane.xlu0 %765 }
 0x7e4   :  { %v767_v44 = vmul.f32 0.03125, %v766_v43 }
 0x7e6   :  { %v768_v45 = vadd.f32 1e-05, %v767_v44 }
 0x7e8   :  { %2583 = vrsqrt.f32 %v768_v45 }
 0x7f5   :  { %v2584_v46 = vpop.eup %2583 }
 0x7f6   :  { %v770_v48 = vmul.f32 %v2584_v46, %v762_v14  ;;  %v2140_v14 = vld [vmem:[#allocation7 + $0x6] ss:$0 sm:$0xff] }
 0x7f8   :  { %v775_v50 = vmul.f32 %v2135_v47, %v770_v48 }
 0x7fa   :  { %v780_v51 = vadd.f32 %v2136_v49, %v775_v50 }
 0x7fc   :  { %2382 = vmatmul.mubr.msk.f32.vlgmr.msra.gmra.mxu0 %vm172_vm3, %v780_v51 }
 0x7fd   :  { %2427 = vmatprep.mubr.msk.f32.mxu0 %vm2710_vm0, %v2709_v0  ;;  %2420 = vmatpush3.msra.mxu0 %v985_v6 }
 0x7fe   :  { %2421 = vmatprep.subr.mxu0 %v2709_v0 }
 0x8bc   :  { %v859_v56 = vpop.f32.mrf.mxu0 }
 0x8bd   :  { %v860_v57 = vadd.f32 %v2137_v55, %v859_v56  ;;  %v1480_v55 = vld [vmem:[#allocation5 + $0x130] sm:$0xff] }
 0x8be   :  { %v2383_v58 = vpop.f32.mrf.mxu0 }
 0x8bf   :  { %v863_v59 = vmax.f32 %v860_v57, 0.0 }
 0x8c1   :  { %2417 = vmatmul.mubr.f32.vlgmr.msra.gmra.mxu1 %v863_v59 }
 0x8c2   :  { %2462 = vmatpush3.msra.mxu1 %v2839_v38  ;;  %2467 = vmatprep.mubr.msk.f32.mxu1 %vm2710_vm0, %v2709_v0 }
 0x8c3   :  { %2463 = vmatprep.subr.mxu1 %v2709_v0 }
 0x8c4   :  { %2464 = vmatpush3.msra.mxu1 %v2841_v39 }
 0x8c5   :  { %2465 = vmatprep.subr.mxu1 %v2709_v0 }
 0x8c6   :  { %2466 = vmatpush3.msra.mxu1 %v2845_v40  ;;  %v984_v40 = vld [vmem:[#allocation5 + $0xf0] sm:$0xff] }
 0x8c7   :  { %2479 = vmatprep.subr.mxu1 %v2709_v0  ;;  %2422 = vmatpush3.msra.mxu0 %v984_v40 }
 0x8c8   :  { %2423 = vmatprep.subr.mxu0 %v2709_v0 }
 0x8c9   :  { %2424 = vmatpush3.msra.mxu0 %v983_v7 }
 0x8ca   :  { %2425 = vmatprep.subr.mxu0 %v2709_v0 }
 0x8cb   :  { %2426 = vmatpush3.msra.mxu0 %v982_v8 }
 0x8cc   :  { %2430 = vmatprep.subr.mxu0 %v2709_v0 }
 0x981   :  { %v951_v61 = vpop.f32.mrf.mxu1 }
 0x982   :  { %v952_v62 = vadd.f32 %v2139_v60, %v951_v61 }
 0x983   :  { %v2418_v63 = vpop.f32.mrf.mxu1 }
 0x984   :  { %v955_v1 = vadd.f32 %v952_v62, %v780_v51 }
 0x986   :  { %v958_v38 = vsel %vm756_vm7, %v955_v1, 0.0 }
 0x987   :  { %959 = vadd.xlane.f32.xlu0 %v958_v38 }
 0xa10   :  { %v960_v2 = vpop.xlane.xlu0 %959 }
 0xa11   :  { %v961_v3 = vmul.f32 0.03125, %v960_v2 }
 0xa13   :  { %v962_v4 = vsub.f32 %v955_v1, %v961_v3  ;;  %v1478_v1 = vld [vmem:[#allocation5 + $0x120] sm:$0xff]  ;;  %v2158_v3 = vld [vmem:[#allocation7 + $0xa] ss:$0 sm:$0xff] }
 0xa15   :  { %v963_v5 = vmul.f32 %v962_v4, %v962_v4 }
 0xa17   :  { %v964_v39 = vsel %vm756_vm7, %v963_v5, 0.0 }
 0xa18   :  { %965 = vadd.xlane.f32.xlu1 %v964_v39 }
 0xaa1   :  { %v966_v9 = vpop.xlane.xlu1 %965 }
 0xaa2   :  { %v967_v11 = vmul.f32 0.03125, %v966_v9 }
 0xaa4   :  { %v968_v12 = vadd.f32 1e-05, %v967_v11 }
 0xaa6   :  { %2585 = vrsqrt.f32 %v968_v12 }
 0xab3   :  { %v2586_v13 = vpop.eup %2585 }
 0xab4   :  { %v970_v15 = vmul.f32 %v2586_v13, %v962_v4  ;;  %v1589_v13 = vld [vmem:[#allocation5 + $0x118] sm:$0xff] }
 0xab6   :  { %v975_v18 = vmul.f32 %v2140_v14, %v970_v15  ;;  %v1588_v14 = vld [vmem:[#allocation5 + $0x110] sm:$0xff]  ;;  %v1587_v15 = vld [vmem:[#allocation5 + $0x108] sm:$0xff] }
 0xab8   :  { %v2910_v21 = vadd.f32 %v2141_v17, %v975_v18  ;;  %v1586_v17 = vld [vmem:[#allocation5 + $0x100] sm:$0xff]  ;;  %v1684_v18 = vld [vmem:[#allocation5 + $0x1b8] sm:$0xff] }
 0xaba   :  { %2428 = vmatmul.mubr.msk.f32.vlgmr.msra.gmra.mxu0 %vm172_vm3, %v2910_v21 }
 0xabb   :  { %2432 = vmatprep.mubr.msk.f32.mxu0 %vm2710_vm0, %v2709_v0 }
 0xb7a   :  { %v1061_v10 = vpop.f32.mrf.mxu0 }
 0xb7b   :  { %v1062_v23 = vadd.f32 %v2142_v22, %v1061_v10  ;;  %v1682_v22 = vld [vmem:[#allocation5 + $0x1a8] sm:$0xff]  ;;  %v1681_v10 = vld [vmem:[#allocation5 + $0x1a0] sm:$0xff] }
 0xb7c   :  { %v2429_v24 = vpop.f32.mrf.mxu0 }
 0xb7d   :  { %1153 = vrot.lane.b32.xlu1 %v1062_v23, %s2711_s2  ;;  %1066 = vrot.lane.b32.xlu0 %v1062_v23, %s2712_s3  ;;  %v1679_v24 = vld [vmem:[#allocation5 + $0x190] sm:$0xff] }
 0xbef   :  { %v1067_v26 = vpop.permute.xlu0 %1066  ;;  %v1154_v27 = vpop.permute.xlu1 %1153 }
 0xbf0   :  { %2431 = vmatpush3.msk.msra.mxu0 %vm89_vm1, %v1067_v26  ;;  %v1678_v26 = vld [vmem:[#allocation5 + $0x188] sm:$0xff] }
 0xbf1   :  { %2433 = vmatmul.mubr.msk.f32.vlgmr.msra.gmra.mxu0 %vm249_vm4, %v2783_v16  ;;  %2441 = vmatprep.subr.mxu0 %v2709_v0 }
 0xbf2   :  { %2442 = vmatpush3.msk.msra.mxu0 %vm89_vm1, %v1154_v27  ;;  %2435 = vmatprep.mubr.msk.f32.mxu0 %vm2710_vm0, %v2709_v0  ;;  %v1677_v27 = vld [vmem:[#allocation5 + $0x180] sm:$0xff] }
 0xbf3   :  { %2452 = vmatprep.subr.mxu0 %v2709_v0 }
 0xbf5   :  { %2436 = vmatmul.mubr.msk.f32.gmra.mxu0 %vm249_vm4, %v2792_v19 }
 0xbf6   :  { %2438 = vmatprep.mubr.msk.f32.mxu0 %vm2710_vm0, %v2709_v0 }
 0xbf9   :  { %2439 = vmatmul.mubr.msk.f32.gmra.mxu0 %vm249_vm4, %v2803_v20 }
 0xbfa   :  { %2443 = vmatprep.mubr.msk.f32.mxu0 %vm2710_vm0, %v2709_v0 }
 0xbfd   :  { %2444 = vmatmul.mubr.msk.f32.vlgmr.msra.gmra.mxu0 %vm249_vm4, %v2783_v16 }
 0xbfe   :  { %2446 = vmatprep.mubr.msk.f32.mxu0 %vm2710_vm0, %v2709_v0 }
 0xc01   :  { %2447 = vmatmul.mubr.msk.f32.gmra.mxu0 %vm249_vm4, %v2792_v19 }
 0xc02   :  { %2449 = vmatprep.mubr.msk.f32.mxu0 %vm2710_vm0, %v2709_v0 }
 0xc05   :  { %2450 = vmatmul.mubr.msk.f32.gmra.mxu0 %vm249_vm4, %v2803_v20 }
 0xc06   :  { %2458 = vmatprep.mubr.msk.f32.mxu0 %vm2710_vm0, %v2709_v0 }
 0xcb1   :  { %v1136_v29 = vpop.f32.mrf.mxu0 }
 0xcb2   :  { %v1150_v42 = vmul.f32 %v1136_v29, %v2825_v31  ;;  %v1676_v29 = vld [vmem:[#allocation5 + $0x178] sm:$0xff] }
 0xcb3   :  { %v2434_v30 = vpop.f32.mrf.mxu0 }
 0xcb4   :  { %v1675_v30 = vld [vmem:[#allocation5 + $0x170] sm:$0xff] }
 0xcb5   :  { %v1141_v32 = vpop.f32.mrf.mxu0 }
 0xcb6   :  { %v1151_v37 = vmul.f32 %v1141_v32, %v2820_v28  ;;  %v1674_v32 = vld [vmem:[#allocation5 + $0x168] sm:$0xff] }
 0xcb7   :  { %v2437_v34 = vpop.f32.mrf.mxu0 }
 0xcb8   :  { %v1673_v34 = vld [vmem:[#allocation5 + $0x160] sm:$0xff] }
 0xcb9   :  { %v1146_v16 = vpop.f32.mrf.mxu0 }
 0xcba   :  { %v1152_v35 = vmul.f32 %v1146_v16, %v2817_v25  ;;  %v1672_v16 = vld [vmem:[#allocation5 + $0x158] sm:$0xff] }
 0xcbb   :  { %v2440_v36 = vpop.f32.mrf.mxu0 }
 0xcbc   :  { %2453 = vmatpush3.xpose.msk.msra.mxu0 %vm172_vm3, %v1152_v35 }
 0xcbd   :  { %2454 = vmatprep.subr.mxu0 %v2709_v0  ;;  %v1223_v19 = vpop.f32.mrf.mxu0 }
 0xcbe   :  { %v1237_v48 = vmul.f32 %v1223_v19, %v2825_v31 }
 0xcbf   :  { %v2445_v41 = vpop.f32.mrf.mxu0 }
 0xcc0   :  { %2455 = vmatpush3.xpose.msk.msra.mxu0 %vm172_vm3, %v1151_v37  ;;  %v2160_v41 = vld [vmem:[#allocation7 + $0xc] ss:$0 sm:$0xff] }
 0xcc1   :  { %2456 = vmatprep.subr.mxu0 %v2709_v0  ;;  %v1228_v20 = vpop.f32.mrf.mxu0 }
 0xcc2   :  { %v1238_v45 = vmul.f32 %v1228_v20, %v2820_v28 }
 0xcc3   :  { %v2448_v43 = vpop.f32.mrf.mxu0 }
 0xcc4   :  { %2457 = vmatpush3.xpose.msk.msra.mxu0 %vm172_vm3, %v1150_v42  ;;  %v2161_v42 = vld [vmem:[#allocation7 + $0xd] ss:$0 sm:$0xff] }
 0xcc5   :  { %v1233_v44 = vpop.f32.mrf.mxu0  ;;  %2470 = vmatprep.subr.mxu0 %v2709_v0 }
 0xcc6   :  { %v1239_v46 = vmul.f32 %v1233_v44, %v2817_v25 }
 0xcc7   :  { %2459 = vmatmul.mubr.msk.f32.vlgmr.msra.gmra.mxu0 %vm172_vm3, %v1062_v23  ;;  %v2451_v47 = vpop.f32.mrf.mxu0  ;;  %v1680_v23 = vld [vmem:[#allocation5 + $0x198] sm:$0xff] }
 0xcc8   :  { %2471 = vmatpush3.msra.mxu0 %v1239_v46  ;;  %2476 = vmatprep.mubr.msk.f32.mxu0 %vm2710_vm0, %v2709_v0  ;;  %v1670_v46 = vld [vmem:[#allocation5 + $0x148] sm:$0xff]  ;;  %v1669_v47 = vld [vmem:[#allocation5 + $0x140] sm:$0xff] }
 0xcc9   :  { %2472 = vmatprep.subr.mxu0 %v2709_v0 }
 0xcca   :  { %2473 = vmatpush3.msra.mxu0 %v1238_v45  ;;  %v1671_v45 = vld [vmem:[#allocation5 + $0x150] sm:$0xff] }
 0xccb   :  { %2474 = vmatprep.subr.mxu0 %v2709_v0 }
 0xccc   :  { %2475 = vmatpush3.msra.mxu0 %v1237_v48  ;;  %v2162_v48 = vld [vmem:[#allocation7 + $0x9] ss:$0 sm:$0xff] }
 0xccd   :  { %2490 = vmatprep.subr.mxu0 %v2709_v0 }
 0xd87   :  { %v1317_v28 = vpop.f32.mrf.mxu0 }
 0xd88   :  { %v1318_v25 = vadd.f32 %v1317_v28, %v2835_v33  ;;  %v1479_v33 = vld [vmem:[#allocation5 + $0x128] sm:$0xff] }
 0xd89   :  { %v2460_v49 = vpop.f32.mrf.mxu0 }
 0xd8a   :  { %v1321_v50 = vsel %vm512_vm5, %v1318_v25, -inf }
 0xd8b   :  { %1322 = vmax.xlane.f32.xlu1 %v1321_v50 }
 0xe14   :  { %v1323_v31 = vpop.xlane.xlu1 %1322 }
 0xe15   :  { %v1324_v51 = vsub.f32 %v1318_v25, %v1323_v31  ;;  %v2164_v31 = vld [vmem:[#allocation7 + $0xb] ss:$0 sm:$0xff] }
 0xe17   :  { %v1325_v52 = vmul.f32 1.442695, %v1324_v51 }
 0xe19   :  { %2587 = vpow2.f32 %v1325_v52 }
 0xe26   :  { %v2588_v53 = vpop.eup %2587 }
 0xe27   :  { %2468 = vmatmul.mubr.msk.f32.vlgmr.msra.gmra.mxu1 %vm519_vm6, %v2588_v53 }
 0xe28   :  { %2487 = vmatprep.mubr.msk.f32.mxu1 %vm2710_vm0, %v2709_v0  ;;  %2480 = vmatpush3.msra.mxu1 %v1481_v54 }
 0xe29   :  { %2481 = vmatprep.subr.mxu1 %v2709_v0 }
 0xe2a   :  { %2482 = vmatpush3.msra.mxu1 %v1480_v55 }
 0xe2b   :  { %2483 = vmatprep.subr.mxu1 %v2709_v0 }
 0xe2c   :  { %2484 = vmatpush3.msra.mxu1 %v1479_v33 }
 0xe2d   :  { %2485 = vmatprep.subr.mxu1 %v2709_v0 }
 0xe2e   :  { %2486 = vmatpush3.msra.mxu1 %v1478_v1  ;;  %v2165_v1 = vld [vmem:[#allocation7 + $0xe] ss:$0 sm:$0xff] }
 0xe2f   :  { %2501 = vmatprep.subr.mxu1 %v2709_v0 }
 0xee7   :  { %v1396_v56 = vpop.f32.mrf.mxu1 }
 0xee8   :  { %v1397_v57 = vadd.f32 1e-30, %v1396_v56 }
 0xee9   :  { %v2469_v58 = vpop.f32.mrf.mxu1 }
 0xeea   :  { %2589 = vrcp.f32 %v1397_v57 }
 0xef7   :  { %v2590_v59 = vpop.eup %2589 }
 0xef8   :  { %v1401_v60 = vmul.f32 %v2590_v59, %v1397_v57 }
 0xefa   :  { %v1402_v61 = vsub.f32 2.0, %v1401_v60 }
 0xefc   :  { %v1403_v62 = vmul.f32 %v2590_v59, %v1402_v61 }
 0xefe   :  { %v1404_v63 = vmul.f32 %v2588_v53, %v1403_v62 }
 0xf00   :  { %2477 = vmatmul.mubr.msk.f32.vlgmr.msra.gmra.mxu0 %vm519_vm6, %v1404_v63 }
 0xf01   :  { %2498 = vmatprep.mubr.msk.f32.mxu0 %vm2710_vm0, %v2709_v0  ;;  %2491 = vmatpush3.msra.mxu0 %v1589_v13 }
 0xf02   :  { %2492 = vmatprep.subr.mxu0 %v2709_v0 }
 0xf03   :  { %2493 = vmatpush3.msra.mxu0 %v1588_v14  ;;  %v1939_v14 = vld [vmem:[#allocation8 + $0x20] sm:$0xff] }
 0xf04   :  { %2494 = vmatprep.subr.mxu0 %v2709_v0 }
 0xf05   :  { %2495 = vmatpush3.msra.mxu0 %v1587_v15 }
 0xf06   :  { %2496 = vmatprep.subr.mxu0 %v2709_v0 }
 0xf07   :  { %2497 = vmatpush3.msra.mxu0 %v1586_v17  ;;  %v1938_v17 = vld [vmem:[#allocation8 + $0x18] sm:$0xff] }
 0xf08   :  { %2536 = vmatprep.subr.mxu0 %v2709_v0 }
 0xfc0   :  { %v1474_v38 = vpop.f32.mrf.mxu0 }
 0xfc1   :  { %2488 = vmatmul.mubr.msk.f32.vlgmr.msra.gmra.mxu1 %vm172_vm3, %v1474_v38 }
 0xfc2   :  { %v2478_v2 = vpop.f32.mrf.mxu0  ;;  %2533 = vmatprep.mubr.msk.f32.mxu1 %vm2710_vm0, %v2709_v0  ;;  %2502 = vmatpush3.msra.mxu1 %v1684_v18  ;;  %v1937_v18 = vld [vmem:[#allocation8 + $0x10] sm:$0xff] }
 0xfc3   :  { %2503 = vmatprep.subr.mxu1 %v2709_v0  ;;  %v2166_v2 = vld [vmem:[#allocation7 + $0xf] ss:$0 sm:$0xff] }
0x1081   :  { %v1556_v4 = vpop.f32.mrf.mxu1 }
0x1082   :  { %v1557_v5 = vadd.f32 %v2158_v3, %v1556_v4 }
0x1083   :  { %v2489_v39 = vpop.f32.mrf.mxu1 }
0x1084   :  { %v1560_v6 = vadd.f32 %v1557_v5, %v2910_v21  ;;  %v1683_v21 = vld [vmem:[#allocation5 + $0x1b0] sm:$0xff]  ;;  %v1786_v5 = vld [vmem:[#allocation8 + $0xa8] sm:$0x3]  ;;  %v1863_v39 = vld [vmem:[#allocation8 + $0xb0] sm:$0x3] }
0x1085   :  { %2504 = vmatpush3.msra.mxu1 %v1683_v21 }
0x1086   :  { %v1563_v40 = vsel %vm756_vm7, %v1560_v6, 0.0  ;;  %2505 = vmatprep.subr.mxu1 %v2709_v0 }
0x1087   :  { %1564 = vadd.xlane.f32.xlu0 %v1563_v40  ;;  %2506 = vmatpush3.msra.mxu1 %v1682_v22  ;;  %v1943_v40 = vld [vmem:[#allocation8 + $0x40] sm:$0xff] }
0x1088   :  { %2507 = vmatprep.subr.mxu1 %v2709_v0 }
0x1089   :  { %2508 = vmatpush3.msra.mxu1 %v1681_v10 }
0x108a   :  { %2509 = vmatprep.subr.mxu1 %v2709_v0 }
0x108b   :  { %2510 = vmatpush3.msra.mxu1 %v1680_v23  ;;  %v2173_v23 = vld [vmem:[#allocation8 + $0xb8] ss:$0 sm:$0xff] }
0x108c   :  { %2511 = vmatprep.subr.mxu1 %v2709_v0 }
0x108d   :  { %2512 = vmatpush3.msra.mxu1 %v1679_v24 }
0x108e   :  { %2513 = vmatprep.subr.mxu1 %v2709_v0 }
0x108f   :  { %2514 = vmatpush3.msra.mxu1 %v1678_v26 }
0x1090   :  { %2515 = vmatprep.subr.mxu1 %v2709_v0 }
0x1091   :  { %2516 = vmatpush3.msra.mxu1 %v1677_v27 }
0x1092   :  { %2517 = vmatprep.subr.mxu1 %v2709_v0 }
0x1093   :  { %2518 = vmatpush3.msra.mxu1 %v1676_v29 }
0x1094   :  { %2519 = vmatprep.subr.mxu1 %v2709_v0 }
0x1095   :  { %2520 = vmatpush3.msra.mxu1 %v1675_v30 }
0x1096   :  { %2521 = vmatprep.subr.mxu1 %v2709_v0 }
0x1097   :  { %2522 = vmatpush3.msra.mxu1 %v1674_v32 }
0x1098   :  { %2523 = vmatprep.subr.mxu1 %v2709_v0 }
0x1099   :  { %2524 = vmatpush3.msra.mxu1 %v1673_v34 }
0x109a   :  { %2525 = vmatprep.subr.mxu1 %v2709_v0 }
0x109b   :  { %2526 = vmatpush3.msra.mxu1 %v1672_v16 }
0x109c   :  { %2527 = vmatprep.subr.mxu1 %v2709_v0 }
0x109d   :  { %2528 = vmatpush3.msra.mxu1 %v1671_v45 }
0x109e   :  { %2529 = vmatprep.subr.mxu1 %v2709_v0 }
0x109f   :  { %2530 = vmatpush3.msra.mxu1 %v1670_v46 }
0x10a0   :  { %2531 = vmatprep.subr.mxu1 %v2709_v0 }
0x10a1   :  { %2532 = vmatpush3.msra.mxu1 %v1669_v47 }
0x1110   :  { %v1565_v7 = vpop.xlane.xlu0 %1564 }
0x1111   :  { %v1566_v8 = vmul.f32 0.03125, %v1565_v7  ;;  %v1942_v7 = vld [vmem:[#allocation8 + $0x38] sm:$0xff] }
0x1113   :  { %v1567_v9 = vsub.f32 %v1560_v6, %v1566_v8  ;;  %v1944_v6 = vld [vmem:[#allocation8 + $0x48] sm:$0xff]  ;;  %v1941_v8 = vld [vmem:[#allocation8 + $0x30] sm:$0xff] }
0x1115   :  { %v1568_v11 = vmul.f32 %v1567_v9, %v1567_v9 }
0x1117   :  { %v1569_v12 = vsel %vm756_vm7, %v1568_v11, 0.0 }
0x1118   :  { %1570 = vadd.xlane.f32.xlu0 %v1569_v12  ;;  %v1940_v12 = vld [vmem:[#allocation8 + $0x28] sm:$0xff] }
0x11a1   :  { %v1571_v35 = vpop.xlane.xlu0 %1570 }
0x11a2   :  { %v1572_v36 = vmul.f32 0.03125, %v1571_v35 }
0x11a4   :  { %v1573_v19 = vadd.f32 1e-05, %v1572_v36 }
0x11a6   :  { %2591 = vrsqrt.f32 %v1573_v19 }
0x11b3   :  { %v2592_v37 = vpop.eup %2591 }
0x11b4   :  { %v1575_v20 = vmul.f32 %v2592_v37, %v1567_v9 }
0x11b6   :  { %v1580_v43 = vmul.f32 %v2160_v41, %v1575_v20 }
0x11b8   :  { %v1585_v44 = vadd.f32 %v2161_v42, %v1580_v43 }
0x11ba   :  { %2499 = vmatmul.mubr.msk.f32.vlgmr.msra.gmra.mxu0 %vm172_vm3, %v1585_v44 }
0x11bb   :  { %2538 = vmatprep.mubr.msk.f32.mxu0 %vm2710_vm0, %v2709_v0 }
0x127a   :  { %v1664_v28 = vpop.f32.mrf.mxu0 }
0x127b   :  { %v1665_v25 = vadd.f32 %v2162_v48, %v1664_v28 }
0x127c   :  { %v2500_v49 = vpop.f32.mrf.mxu0 }
0x127d   :  { %v1668_v50 = vmax.f32 %v1665_v25, 0.0 }
0x127f   :  { %2534 = vmatmul.mubr.f32.vlgmr.msra.gmra.mxu1 %v1668_v50 }
0x133f   :  { %v1756_v51 = vpop.f32.mrf.mxu1 }
0x1340   :  { %v1757_v52 = vadd.f32 %v2164_v31, %v1756_v51 }
0x1341   :  { %v2535_v53 = vpop.f32.mrf.mxu1 }
0x1342   :  { %v1760_v54 = vadd.f32 %v1757_v52, %v1585_v44 }
0x1344   :  { %v1763_v55 = vsel %vm756_vm7, %v1760_v54, 0.0 }
0x1345   :  { %1764 = vadd.xlane.f32.xlu1 %v1763_v55 }
0x13ce   :  { %v1765_v33 = vpop.xlane.xlu1 %1764 }
0x13cf   :  { %v1766_v56 = vmul.f32 0.03125, %v1765_v33 }
0x13d1   :  { %v1767_v57 = vsub.f32 %v1760_v54, %v1766_v56 }
0x13d3   :  { %v1768_v58 = vmul.f32 %v1767_v57, %v1767_v57 }
0x13d5   :  { %v1769_v59 = vsel %vm756_vm7, %v1768_v58, 0.0 }
0x13d6   :  { %1770 = vadd.xlane.f32.xlu0 %v1769_v59 }
0x145f   :  { %v1771_v60 = vpop.xlane.xlu0 %1770 }
0x1460   :  { %v1772_v61 = vmul.f32 0.03125, %v1771_v60 }
0x1462   :  { %v1773_v62 = vadd.f32 1e-05, %v1772_v61 }
0x1464   :  { %2593 = vrsqrt.f32 %v1773_v62 }
0x1471   :  { %v2594_v63 = vpop.eup %2593 }
0x1472   :  { %v1775_v38 = vmul.f32 %v2594_v63, %v1767_v57 }
0x1474   :  { %v1780_v3 = vmul.f32 %v2165_v1, %v1775_v38 }
0x1476   :  { %v1785_v4 = vadd.f32 %v2166_v2, %v1780_v3 }
0x1478   :  { %2537 = vmatpush3.msk.msra.mxu0 %vm89_vm1, %v1785_v4 }
0x1479   :  { %2539 = vmatmul.mubr.msk.f32.vlgmr.msra.gmra.mxu0 %vm249_vm4, %v1786_v5  ;;  %2541 = vmatprep.subr.mxu0 %v2709_v0 }
0x147a   :  { %2542 = vmatpush3.msk.msra.mxu0 %vm89_vm1, %v1785_v4  ;;  %2543 = vmatprep.mubr.msk.f32.mxu0 %vm2710_vm0, %v2709_v0 }
0x147b   :  { %2546 = vmatprep.subr.mxu0 %v2709_v0 }
0x147d   :  { %2544 = vmatmul.mubr.msk.f32.vlgmr.msra.gmra.mxu0 %vm249_vm4, %v1863_v39 }
0x147e   :  { %2547 = vmatpush3.msra.mxu0 %v1944_v6  ;;  %2554 = vmatprep.mubr.msk.f32.mxu0 %vm2710_vm0, %v2709_v0 }
0x147f   :  { %2548 = vmatprep.subr.mxu0 %v2709_v0 }
0x1480   :  { %2549 = vmatpush3.msra.mxu0 %v1943_v40 }
0x1481   :  { %2550 = vmatprep.subr.mxu0 %v2709_v0 }
0x1482   :  { %2551 = vmatpush3.msra.mxu0 %v1942_v7 }
0x1483   :  { %2552 = vmatprep.subr.mxu0 %v2709_v0 }
0x1484   :  { %2553 = vmatpush3.msra.mxu0 %v1941_v8 }
0x1485   :  { %2557 = vmatprep.subr.mxu0 %v2709_v0 }
0x1539   :  { %v1859_v9 = vpop.f32.mrf.mxu0 }
0x153b   :  { %v2540_v11 = vpop.f32.mrf.mxu0 }
0x153d   :  { %v1933_v13 = vpop.f32.mrf.mxu0 }
0x153e   :  { %2555 = vmatmul.mubr.msk.f32.vlgmr.msra.gmra.mxu0 %vm172_vm3, %v1933_v13 }
0x153f   :  { %2558 = vmatpush3.msra.mxu0 %v1940_v12  ;;  %v2545_v15 = vpop.f32.mrf.mxu0  ;;  %2565 = vmatprep.mubr.msk.f32.mxu0 %vm2710_vm0, %v2709_v0 }
0x1540   :  { %2559 = vmatprep.subr.mxu0 %v2709_v0 }
0x1541   :  { %2560 = vmatpush3.msra.mxu0 %v1939_v14 }
0x1542   :  { %2561 = vmatprep.subr.mxu0 %v2709_v0 }
0x1543   :  { %2562 = vmatpush3.msra.mxu0 %v1938_v17 }
0x1544   :  { %2563 = vmatprep.subr.mxu0 %v2709_v0 }
0x1545   :  { %2564 = vmatpush3.msra.mxu0 %v1937_v18 }
0x1546   :  { %2566 = vmatmul.mubr.msk.f32.vlgmr.msra.gmra.mxu0 %vm172_vm3, %v1859_v9 }
0x15fe   :  { %v2014_v21 = vpop.f32.mrf.mxu0 }
0x1600   :  { %v2556_v22 = vpop.f32.mrf.mxu0 }
0x1606   :  { %v2087_v10 = vpop.f32.mrf.mxu0 }
0x1607   :  { %v2088_v24 = vadd.f32 %v2087_v10, %v2014_v21 }
0x1608   :  { %v2567_v26 = vpop.f32.mrf.mxu0 }
0x1609   :  { %v2096_v27 = vadd.f32 %v2173_v23, %v2088_v24 }
0x160b   :  { %2097 = vst [vmem:[#allocation10] sm:$0x3] %v2096_v27 }
0x160c   :  { %2686 = shalt.err (!%p2683_p10)
}
0x160d   :  { %2107 = dma.vmem_to_hbm [thread:$0]  %s2105_s10, 32, %s3034_s4, [#allocation4]  }
0x160e   :  { %2701 = dma.done.wait [#allocation4], 32  }
0x160f   :  { %2702 = vsyncadd [#allocation4], 4294967264 }
0x1610   :  { %2111 = vsyncpa [#allocation3], 1 }
0x1611   :  { %2112 = vsyncpa [#allocation6], 1 }
0x1612   :  { %2113 = vsyncpa [#allocation9], 1 }
0x1613   :  { %2114 = vsyncpa [#allocation4], 1 }

</bundles_post_ra>
